<compile_context>
chip_gen: v6e
topology: v6e:2x2x1
jax: 0.10.0
libtpu: 0.0.40
codegen_flags: <defaults>
</compile_context>

<pallas_src>
import jax
import jax.numpy as jnp
from jax import lax
from jax.experimental import pallas as pl
from jax.experimental.pallas import tpu as pltpu

BITWIDTH = 2
BN_EPS = 1e-5
N_LEVELS = float(2 ** BITWIDTH - 1)          # 3.0 for 2-bit PACT/DoReFa


# ----------------------------------------------------------------------------
# Parameter-side quantization (DoReFa weight quantization) -- plain JAX glue.
# ----------------------------------------------------------------------------
def dorefa_quantize_weight(w, k):
    t = jnp.tanh(w)
    t = t / (2.0 * jnp.max(jnp.abs(t))) + 0.5
    n = float(2 ** k - 1)
    return 2.0 * (jnp.round(n * t) / n) - 1.0


def pact_ref(x, alpha, k):
    n = float(2 ** k - 1)
    y = jnp.clip(x, 0.0, alpha)
    s = n / alpha
    return jnp.round(y * s) / s


# ----------------------------------------------------------------------------
# Helpers
# ----------------------------------------------------------------------------
def _pick_batch_block(n, m_per_image, target=1024):
    """Largest divisor of n so nb*(ho*wo) lands near an MXU-friendly M target."""
    nb = max(1, min(n, target // max(m_per_image, 1)))
    while n % nb:
        nb -= 1
    return nb


def _vmem_limit_bytes():
    # Raise the scoped-VMEM limit where the chip has headroom (v5e/v6e: 128 MiB
    # physical -> 96 MiB), stay conservative on v7x (64 MiB physical -> 48 MiB).
    try:
        cap = int(pltpu.get_tpu_info().vmem_capacity_bytes)
        return int(max(32 * 1024 * 1024, min(cap * 3 // 4, 96 * 1024 * 1024)))
    except Exception:
        return 32 * 1024 * 1024


# ----------------------------------------------------------------------------
# Fully fused BasicBlock kernel
# ----------------------------------------------------------------------------
def _make_block_kernel(stride, downsample, nb, h, w, cin, planes):
    s = stride
    ho = (h + 2 - 3) // s + 1
    wo = (w + 2 - 3) // s + 1
    M = nb * ho * wo
    pad_lo = planes // 4
    pad_hi = planes - cin - pad_lo

    def kernel(alphas_ref, x_ref, w1_ref, b1_ref, w2_ref, s2_ref, b2_ref,
               o_ref, p_ref):
        alpha1 = alphas_ref[0, 0]
        alpha2 = alphas_ref[0, 1]

        # ---- conv1 + BN1 (scale folded into w1): 9 taps packed into K,
        #      ONE f32 MXU matmul (input is not quantized -> keep f32). ----
        taps = []
        for kh in range(3):
            for kw in range(3):
                slab = x_ref[:, kh % s, kw % s,
                             pl.ds(kh // s, ho), pl.ds(kw // s, wo), :]
                taps.append(slab.reshape(M, cin))
        lhs1 = jnp.concatenate(taps, axis=-1)                        # (M, 9*cin)
        y1 = jnp.dot(lhs1, w1_ref[...],
                     preferred_element_type=jnp.float32) + b1_ref[...]

        # ---- PACT1 -> exact integer codes {0..3}, written into a zero-padded
        #      VMEM scratch (halo for conv2). ----
        codes1 = jnp.round(jnp.clip(y1, 0.0, alpha1) * (N_LEVELS / alpha1))
        p_ref[...] = jnp.zeros_like(p_ref)
        p_ref[:, pl.ds(1, ho), pl.ds(1, wo), :] = codes1.reshape(nb, ho, wo, planes)

        # ---- conv2 in the code domain: bf16 integer codes are exact, MXU
        #      accumulates in f32; 9 taps packed into K, ONE matmul. ----
        taps2 = []
        for kh in range(3):
            for kw in range(3):
                slab = p_ref[:, pl.ds(kh, ho), pl.ds(kw, wo), :]
                taps2.append(slab.reshape(M, planes).astype(jnp.bfloat16))
        lhs2 = jnp.concatenate(taps2, axis=-1)                       # (M, 9*planes)
        acc2 = jnp.dot(lhs2, w2_ref[...], preferred_element_type=jnp.float32)
        # s2_ref = BN2 scale * alpha1/9 (activation + weight dequant folded).
        y2 = acc2 * s2_ref[...] + b2_ref[...]

        # ---- option-'A' shortcut, read straight from the conv1 input block ----
        if downsample:
            # x[:, ::2, ::2, :] == x6[:, 1, 1, :ho, :wo, :]; channel zero-pad is
            # a cheap in-vreg lane concat (never materialized in HBM).
            res = x_ref[:, 1, 1, pl.ds(0, ho), pl.ds(0, wo), :].reshape(M, cin)
            parts = []
            if pad_lo > 0:
                parts.append(jnp.zeros((M, pad_lo), jnp.float32))
            parts.append(res)
            if pad_hi > 0:
                parts.append(jnp.zeros((M, pad_hi), jnp.float32))
            res = jnp.concatenate(parts, axis=-1) if len(parts) > 1 else res
        else:
            res = x_ref[:, 0, 0, pl.ds(1, ho), pl.ds(1, wo), :].reshape(M, planes)
        y2 = y2 + res

        # ---- PACT2 + single store per grid step ----
        y2 = jnp.clip(y2, 0.0, alpha2)
        y2 = jnp.round(y2 * (N_LEVELS / alpha2)) * (alpha2 / N_LEVELS)
        o_ref[...] = y2.reshape(nb, ho * wo, planes)

    return kernel


def basic_block_forward(x_nchw, params, in_planes, planes, stride):
    # TODO(synk): BatchNorm is implemented in inference mode (running stats
    # folded into weights/bias); training-mode batch statistics not computed.
    n, cin, h, w = x_nchw.shape
    assert cin == in_planes
    s = stride
    downsample = (stride != 1) or (in_planes != planes)
    if downsample:
        assert stride == 2 and in_planes + 2 * (planes // 4) == planes, \
            "option-'A' shortcut only supported for the standard stride-2 block"
    ho = (h + 2 - 3) // s + 1
    wo = (w + 2 - 3) // s + 1
    # NOTE: wo should be a multiple of 8 for layout-free (hb,wo,c)->(hb*wo,c)
    # merges; true for these test shapes.

    x = jnp.transpose(x_nchw, (0, 2, 3, 1))                  # NCHW -> NHWC (boundary only)

    # ---- DoReFa weight quantization + BN folding (plain JAX glue) ----
    w1q = dorefa_quantize_weight(params["conv1_w"], BITWIDTH)   # (O, I, 3, 3)
    w2q = dorefa_quantize_weight(params["conv2_w"], BITWIDTH)
    scale1 = params["bn1_gamma"] / jnp.sqrt(params["bn1_var"] + BN_EPS)
    bias1 = params["bn1_beta"] - params["bn1_mean"] * scale1
    scale2 = params["bn2_gamma"] / jnp.sqrt(params["bn2_var"] + BN_EPS)
    bias2 = params["bn2_beta"] - params["bn2_mean"] * scale2

    def pack_taps(w_oihw):                                    # OIHW -> (9*I, O), tap-major
        o, i, _, _ = w_oihw.shape
        return jnp.transpose(w_oihw, (2, 3, 1, 0)).reshape(9 * i, o)

    # conv1: f32 operands, BN1 scale folded into the packed weights.
    w1_packed = pack_taps(w1q) * scale1[None, :]
    # conv2: exact integer codes {-3,-1,1,3} as bf16 MXU operands; the combined
    # dequant (alpha1/9) and BN2 scale stay in the f32 epilogue for fidelity.
    w2_codes = jnp.round(pack_taps(w2q) * N_LEVELS).astype(jnp.bfloat16)
    scale2c = scale2 * params["alpha1"] / (N_LEVELS * N_LEVELS)

    # ---- conv1 input: pad (+ space-to-depth for stride 2), one wrapper pass ----
    if s == 1:
        x_pad = jnp.pad(x, ((0, 0), (1, 1), (1, 1), (0, 0)))
        x6 = x_pad.reshape(n, 1, 1, h + 2, w + 2, cin)
    else:
        hp2 = -(-(h + 2) // s) * s
        wp2 = -(-(w + 2) // s) * s
        x_pad = jnp.pad(x, ((0, 0), (1, hp2 - h - 1), (1, wp2 - w - 1), (0, 0)))
        x6 = jnp.transpose(x_pad.reshape(n, hp2 // s, s, wp2 // s, s, cin),
                           (0, 2, 4, 1, 3, 5))
    _, s0, s1, hp, wp, _ = x6.shape

    nb = _pick_batch_block(n, ho * wo)
    kernel = _make_block_kernel(s, downsample, nb, h, w, cin, planes)

    alphas = jnp.stack([params["alpha1"], params["alpha2"]]
                       ).reshape(1, 2).astype(jnp.float32)

    out = pl.pallas_call(
        kernel,
        grid=(n // nb,),
        in_specs=[
            pl.BlockSpec((1, 2), lambda i: (0, 0), memory_space=pltpu.SMEM),
            pl.BlockSpec((nb, s0, s1, hp, wp, cin), lambda i: (i, 0, 0, 0, 0, 0)),
            pl.BlockSpec((9 * cin, planes), lambda i: (0, 0)),
            pl.BlockSpec((1, planes), lambda i: (0, 0)),
            pl.BlockSpec((9 * planes, planes), lambda i: (0, 0)),
            pl.BlockSpec((1, planes), lambda i: (0, 0)),
            pl.BlockSpec((1, planes), lambda i: (0, 0)),
        ],
        out_specs=pl.BlockSpec((nb, ho * wo, planes), lambda i: (i, 0, 0)),
        out_shape=jax.ShapeDtypeStruct((n, ho * wo, planes), jnp.float32),
        scratch_shapes=[pltpu.VMEM((nb, ho + 2, wo + 2, planes), jnp.float32)],
        compiler_params=pltpu.CompilerParams(
            dimension_semantics=("parallel",),
            vmem_limit_bytes=_vmem_limit_bytes()),
    )(alphas, x6, w1_packed, jnp.reshape(bias1, (1, planes)),
      w2_codes, jnp.reshape(scale2c, (1, planes)), jnp.reshape(bias2, (1, planes)))

    out = out.reshape(n, ho, wo, planes)
    return jnp.transpose(out, (0, 3, 1, 2))                  # NHWC -> NCHW


# ----------------------------------------------------------------------------
# Parameter init + pure-JAX reference (lax.conv) for validation
# ----------------------------------------------------------------------------
def init_basic_block_params(key, in_planes, planes):
    ks = jax.random.split(key, 10)
    p = {}
    p["conv1_w"] = 0.3 * jax.random.normal(ks[0], (planes, in_planes, 3, 3), jnp.float32)
    p["conv2_w"] = 0.3 * jax.random.normal(ks[1], (planes, planes, 3, 3), jnp.float32)
    p["bn1_gamma"] = 1.0 + 0.1 * jax.random.normal(ks[2], (planes,), jnp.float32)
    p["bn1_beta"] = 0.1 * jax.random.normal(ks[3], (planes,), jnp.float32)
    p["bn1_mean"] = 0.1 * jax.random.normal(ks[4], (planes,), jnp.float32)
    p["bn1_var"] = jax.random.uniform(ks[5], (planes,), jnp.float32, 0.5, 1.5)
    p["bn2_gamma"] = 1.0 + 0.1 * jax.random.normal(ks[6], (planes,), jnp.float32)
    p["bn2_beta"] = 0.1 * jax.random.normal(ks[7], (planes,), jnp.float32)
    p["bn2_mean"] = 0.1 * jax.random.normal(ks[8], (planes,), jnp.float32)
    p["bn2_var"] = jax.random.uniform(ks[9], (planes,), jnp.float32, 0.5, 1.5)
    p["alpha1"] = jnp.asarray(10.0, jnp.float32)
    p["alpha2"] = jnp.asarray(10.0, jnp.float32)
    return p


def reference_forward(x_nchw, params, in_planes, planes, stride):
    w1q = dorefa_quantize_weight(params["conv1_w"], BITWIDTH)
    w2q = dorefa_quantize_weight(params["conv2_w"], BITWIDTH)
    scale1 = params["bn1_gamma"] / jnp.sqrt(params["bn1_var"] + BN_EPS)
    bias1 = params["bn1_beta"] - params["bn1_mean"] * scale1
    scale2 = params["bn2_gamma"] / jnp.sqrt(params["bn2_var"] + BN_EPS)
    bias2 = params["bn2_beta"] - params["bn2_mean"] * scale2

    def conv(x, w, s):
        return lax.conv_general_dilated(x, w, (s, s), ((1, 1), (1, 1)),
                                        dimension_numbers=("NCHW", "OIHW", "NCHW"))

    o = conv(x_nchw, w1q, stride)
    o = o * scale1[None, :, None, None] + bias1[None, :, None, None]
    o = pact_ref(o, params["alpha1"], BITWIDTH)
    o = conv(o, w2q, 1)
    o = o * scale2[None, :, None, None] + bias2[None, :, None, None]
    if stride != 1 or in_planes != planes:
        sc = x_nchw[:, :, ::2, ::2]
        pad = planes // 4
        sc = jnp.pad(sc, ((0, 0), (pad, pad), (0, 0), (0, 0)))
    else:
        sc = x_nchw
    o = o + sc
    return pact_ref(o, params["alpha2"], BITWIDTH)


if __name__ == "__main__":
    key = jax.random.PRNGKey(0)

    # Case 1: stride-2 downsample block (exercises the option-'A' shortcut).
    in_planes, planes, stride = 4, 8, 2
    kp, kx, key = jax.random.split(key, 3)
    params = init_basic_block_params(kp, in_planes, planes)
    x = jax.random.normal(kx, (2, in_planes, 16, 16), jnp.float32)   # NCHW
    out = jax.block_until_ready(basic_block_forward(x, params, in_planes, planes, stride))
    ref = reference_forward(x, params, in_planes, planes, stride)
    assert out.shape == ref.shape == (2, planes, 8, 8), out.shape
    err1 = float(jnp.max(jnp.abs(out - ref)))
    assert err1 < 1e-3, f"downsample block: max abs error vs reference: {err1}"

    # Case 2: stride-1 identity-shortcut block.
    in_planes, planes, stride = 8, 8, 1
    kp, kx, key = jax.random.split(key, 3)
    params = init_basic_block_params(kp, in_planes, planes)
    x = jax.random.normal(kx, (2, in_planes, 16, 16), jnp.float32)
    out = jax.block_until_ready(basic_block_forward(x, params, in_planes, planes, stride))
    ref = reference_forward(x, params, in_planes, planes, stride)
    assert out.shape == ref.shape == (2, planes, 16, 16), out.shape
    err2 = float(jnp.max(jnp.abs(out - ref)))
    assert err2 < 1e-3, f"identity block: max abs error vs reference: {err2}"

    print("KERNEL_OK")
</pallas_src>

<mosaic_0001>
module attributes {stable_mosaic.version = 11 : i64} {
  func.func @kernel(%arg0: i32, %arg1: memref<1x2xf32, #tpu.memory_space<smem>>, %arg2: memref<2x2x2x9x9x4xf32, #tpu.memory_space<vmem>>, %arg3: memref<36x8xf32, #tpu.memory_space<vmem>>, %arg4: memref<1x8xf32, #tpu.memory_space<vmem>>, %arg5: memref<72x8xbf16, #tpu.memory_space<vmem>>, %arg6: memref<1x8xf32, #tpu.memory_space<vmem>>, %arg7: memref<1x8xf32, #tpu.memory_space<vmem>>, %arg8: memref<2x64x8xf32, #tpu.memory_space<vmem>>, %arg9: memref<2x10x10x8xf32, #tpu.memory_space<vmem>>) attributes {dimension_semantics = [#tpu.dimension_semantics<parallel>], iteration_bounds = array<i64: 1>, scalar_prefetch = 0 : i64, scratch_operands = 1 : i64, tpu.core_type = #tpu.core_type<tc>, window_params = [{transform_indices = @transform_0, window_bounds = array<i64: 1, 2>}, {transform_indices = @transform_1, window_bounds = array<i64: 2, 2, 2, 9, 9, 4>}, {pipeline_mode = #tpu.pipeline_mode<synchronous>, transform_indices = @transform_2, window_bounds = array<i64: 36, 8>}, {pipeline_mode = #tpu.pipeline_mode<synchronous>, transform_indices = @transform_3, window_bounds = array<i64: 1, 8>}, {pipeline_mode = #tpu.pipeline_mode<synchronous>, transform_indices = @transform_4, window_bounds = array<i64: 72, 8>}, {pipeline_mode = #tpu.pipeline_mode<synchronous>, transform_indices = @transform_5, window_bounds = array<i64: 1, 8>}, {pipeline_mode = #tpu.pipeline_mode<synchronous>, transform_indices = @transform_6, window_bounds = array<i64: 1, 8>}, {transform_indices = @transform_7, window_bounds = array<i64: 2, 64, 8>}]} {
    %c0 = arith.constant 0 : index
    %c0_0 = arith.constant 0 : index
    %0 = memref.load %arg1[%c0, %c0_0] : memref<1x2xf32, #tpu.memory_space<smem>>
    %c0_1 = arith.constant 0 : index
    %c1 = arith.constant 1 : index
    %1 = memref.load %arg1[%c0_1, %c1] : memref<1x2xf32, #tpu.memory_space<smem>>
    %c0_2 = arith.constant 0 : index
    %c0_3 = arith.constant 0 : index
    %c0_4 = arith.constant 0 : index
    %c0_5 = arith.constant 0 : index
    %c0_6 = arith.constant 0 : index
    %c0_7 = arith.constant 0 : index
    %2 = vector.load %arg2[%c0_2, %c0_3, %c0_4, %c0_5, %c0_6, %c0_7] : memref<2x2x2x9x9x4xf32, #tpu.memory_space<vmem>>, vector<2x1x1x8x8x4xf32>
    %3 = vector.shape_cast %2 : vector<2x1x1x8x8x4xf32> to vector<2x8x8x4xf32>
    %4 = vector.shape_cast %3 : vector<2x8x8x4xf32> to vector<128x4xf32>
    %c0_8 = arith.constant 0 : index
    %c0_9 = arith.constant 0 : index
    %c1_10 = arith.constant 1 : index
    %c0_11 = arith.constant 0 : index
    %c0_12 = arith.constant 0 : index
    %c0_13 = arith.constant 0 : index
    %5 = vector.load %arg2[%c0_8, %c0_9, %c1_10, %c0_11, %c0_12, %c0_13] : memref<2x2x2x9x9x4xf32, #tpu.memory_space<vmem>>, vector<2x1x1x8x8x4xf32>
    %6 = vector.shape_cast %5 : vector<2x1x1x8x8x4xf32> to vector<2x8x8x4xf32>
    %7 = vector.shape_cast %6 : vector<2x8x8x4xf32> to vector<128x4xf32>
    %c0_14 = arith.constant 0 : index
    %c0_15 = arith.constant 0 : index
    %c0_16 = arith.constant 0 : index
    %c0_17 = arith.constant 0 : index
    %c1_18 = arith.constant 1 : index
    %c0_19 = arith.constant 0 : index
    %8 = vector.load %arg2[%c0_14, %c0_15, %c0_16, %c0_17, %c1_18, %c0_19] : memref<2x2x2x9x9x4xf32, #tpu.memory_space<vmem>>, vector<2x1x1x8x8x4xf32>
    %9 = vector.shape_cast %8 : vector<2x1x1x8x8x4xf32> to vector<2x8x8x4xf32>
    %10 = vector.shape_cast %9 : vector<2x8x8x4xf32> to vector<128x4xf32>
    %c0_20 = arith.constant 0 : index
    %c1_21 = arith.constant 1 : index
    %c0_22 = arith.constant 0 : index
    %c0_23 = arith.constant 0 : index
    %c0_24 = arith.constant 0 : index
    %c0_25 = arith.constant 0 : index
    %11 = vector.load %arg2[%c0_20, %c1_21, %c0_22, %c0_23, %c0_24, %c0_25] : memref<2x2x2x9x9x4xf32, #tpu.memory_space<vmem>>, vector<2x1x1x8x8x4xf32>
    %12 = vector.shape_cast %11 : vector<2x1x1x8x8x4xf32> to vector<2x8x8x4xf32>
    %13 = vector.shape_cast %12 : vector<2x8x8x4xf32> to vector<128x4xf32>
    %c0_26 = arith.constant 0 : index
    %c1_27 = arith.constant 1 : index
    %c1_28 = arith.constant 1 : index
    %c0_29 = arith.constant 0 : index
    %c0_30 = arith.constant 0 : index
    %c0_31 = arith.constant 0 : index
    %14 = vector.load %arg2[%c0_26, %c1_27, %c1_28, %c0_29, %c0_30, %c0_31] : memref<2x2x2x9x9x4xf32, #tpu.memory_space<vmem>>, vector<2x1x1x8x8x4xf32>
    %15 = vector.shape_cast %14 : vector<2x1x1x8x8x4xf32> to vector<2x8x8x4xf32>
    %16 = vector.shape_cast %15 : vector<2x8x8x4xf32> to vector<128x4xf32>
    %c0_32 = arith.constant 0 : index
    %c1_33 = arith.constant 1 : index
    %c0_34 = arith.constant 0 : index
    %c0_35 = arith.constant 0 : index
    %c1_36 = arith.constant 1 : index
    %c0_37 = arith.constant 0 : index
    %17 = vector.load %arg2[%c0_32, %c1_33, %c0_34, %c0_35, %c1_36, %c0_37] : memref<2x2x2x9x9x4xf32, #tpu.memory_space<vmem>>, vector<2x1x1x8x8x4xf32>
    %18 = vector.shape_cast %17 : vector<2x1x1x8x8x4xf32> to vector<2x8x8x4xf32>
    %19 = vector.shape_cast %18 : vector<2x8x8x4xf32> to vector<128x4xf32>
    %c0_38 = arith.constant 0 : index
    %c0_39 = arith.constant 0 : index
    %c0_40 = arith.constant 0 : index
    %c1_41 = arith.constant 1 : index
    %c0_42 = arith.constant 0 : index
    %c0_43 = arith.constant 0 : index
    %20 = vector.load %arg2[%c0_38, %c0_39, %c0_40, %c1_41, %c0_42, %c0_43] : memref<2x2x2x9x9x4xf32, #tpu.memory_space<vmem>>, vector<2x1x1x8x8x4xf32>
    %21 = vector.shape_cast %20 : vector<2x1x1x8x8x4xf32> to vector<2x8x8x4xf32>
    %22 = vector.shape_cast %21 : vector<2x8x8x4xf32> to vector<128x4xf32>
    %c0_44 = arith.constant 0 : index
    %c0_45 = arith.constant 0 : index
    %c1_46 = arith.constant 1 : index
    %c1_47 = arith.constant 1 : index
    %c0_48 = arith.constant 0 : index
    %c0_49 = arith.constant 0 : index
    %23 = vector.load %arg2[%c0_44, %c0_45, %c1_46, %c1_47, %c0_48, %c0_49] : memref<2x2x2x9x9x4xf32, #tpu.memory_space<vmem>>, vector<2x1x1x8x8x4xf32>
    %24 = vector.shape_cast %23 : vector<2x1x1x8x8x4xf32> to vector<2x8x8x4xf32>
    %25 = vector.shape_cast %24 : vector<2x8x8x4xf32> to vector<128x4xf32>
    %c0_50 = arith.constant 0 : index
    %c0_51 = arith.constant 0 : index
    %c0_52 = arith.constant 0 : index
    %c1_53 = arith.constant 1 : index
    %c1_54 = arith.constant 1 : index
    %c0_55 = arith.constant 0 : index
    %26 = vector.load %arg2[%c0_50, %c0_51, %c0_52, %c1_53, %c1_54, %c0_55] : memref<2x2x2x9x9x4xf32, #tpu.memory_space<vmem>>, vector<2x1x1x8x8x4xf32>
    %27 = vector.shape_cast %26 : vector<2x1x1x8x8x4xf32> to vector<2x8x8x4xf32>
    %28 = vector.shape_cast %27 : vector<2x8x8x4xf32> to vector<128x4xf32>
    %29 = tpu.concatenate %4, %7, %10, %13, %16, %19, %22, %25, %28 in 1 : vector<128x4xf32>, vector<128x4xf32>, vector<128x4xf32>, vector<128x4xf32>, vector<128x4xf32>, vector<128x4xf32>, vector<128x4xf32>, vector<128x4xf32>, vector<128x4xf32> -> vector<128x36xf32>
    %c0_56 = arith.constant 0 : index
    %c0_57 = arith.constant 0 : index
    %30 = vector.load %arg3[%c0_56, %c0_57] : memref<36x8xf32, #tpu.memory_space<vmem>>, vector<36x8xf32>
    %cst = arith.constant dense<0.000000e+00> : vector<128x8xf32>
    %31 = tpu.matmul %29, %30, %cst {dimension_numbers = #tpu.dot_dimension_numbers<[1], [0], [0], [1], [0, 0, 1, 1], [], []>} : vector<128x36xf32>, vector<36x8xf32>, vector<128x8xf32> -> vector<128x8xf32>
    %c0_58 = arith.constant 0 : index
    %c0_59 = arith.constant 0 : index
    %32 = vector.load %arg4[%c0_58, %c0_59] : memref<1x8xf32, #tpu.memory_space<vmem>>, vector<1x8xf32>
    %33 = vector.broadcast %32 : vector<1x8xf32> to vector<128x8xf32>
    %34 = arith.addf %31, %33 : vector<128x8xf32>
    %cst_60 = arith.constant 0.000000e+00 : f32
    %35 = vector.broadcast %cst_60 : f32 to vector<128x8xf32>
    %36 = arith.maximumf %35, %34 : vector<128x8xf32>
    %37 = vector.broadcast %0 : f32 to vector<128x8xf32>
    %38 = arith.minimumf %37, %36 : vector<128x8xf32>
    %cst_61 = arith.constant 3.000000e+00 : f32
    %39 = arith.divf %cst_61, %0 : f32
    %40 = vector.broadcast %39 : f32 to vector<128x8xf32>
    %41 = arith.mulf %38, %40 : vector<128x8xf32>
    %42 = math.roundeven %41 : vector<128x8xf32>
    %cst_62 = arith.constant 0.000000e+00 : f32
    %43 = vector.broadcast %cst_62 : f32 to vector<2x10x10x8xf32>
    %c0_63 = arith.constant 0 : index
    %c0_64 = arith.constant 0 : index
    %c0_65 = arith.constant 0 : index
    %c0_66 = arith.constant 0 : index
    %44 = vector.load %arg9[%c0_63, %c0_64, %c0_65, %c0_66] : memref<2x10x10x8xf32, #tpu.memory_space<vmem>>, vector<2x10x10x8xf32>
    tpu.vector_store %arg9[%c0_63, %c0_64, %c0_65, %c0_66], %43 {strides = array<i32>} : memref<2x10x10x8xf32, #tpu.memory_space<vmem>>, vector<2x10x10x8xf32>,
    %45 = vector.shape_cast %42 : vector<128x8xf32> to vector<2x8x8x8xf32>
    %c0_67 = arith.constant 0 : index
    %c1_68 = arith.constant 1 : index
    %c1_69 = arith.constant 1 : index
    %c0_70 = arith.constant 0 : index
    %46 = vector.load %arg9[%c0_67, %c1_68, %c1_69, %c0_70] : memref<2x10x10x8xf32, #tpu.memory_space<vmem>>, vector<2x8x8x8xf32>
    tpu.vector_store %arg9[%c0_67, %c1_68, %c1_69, %c0_70], %45 {strides = array<i32>} : memref<2x10x10x8xf32, #tpu.memory_space<vmem>>, vector<2x8x8x8xf32>,
    %c0_71 = arith.constant 0 : index
    %c0_72 = arith.constant 0 : index
    %c0_73 = arith.constant 0 : index
    %c0_74 = arith.constant 0 : index
    %47 = vector.load %arg9[%c0_71, %c0_72, %c0_73, %c0_74] : memref<2x10x10x8xf32, #tpu.memory_space<vmem>>, vector<2x8x8x8xf32>
    %48 = vector.shape_cast %47 : vector<2x8x8x8xf32> to vector<128x8xf32>
    %49 = arith.truncf %48 : vector<128x8xf32> to vector<128x8xbf16>
    %c0_75 = arith.constant 0 : index
    %c0_76 = arith.constant 0 : index
    %c1_77 = arith.constant 1 : index
    %c0_78 = arith.constant 0 : index
    %50 = vector.load %arg9[%c0_75, %c0_76, %c1_77, %c0_78] : memref<2x10x10x8xf32, #tpu.memory_space<vmem>>, vector<2x8x8x8xf32>
    %51 = vector.shape_cast %50 : vector<2x8x8x8xf32> to vector<128x8xf32>
    %52 = arith.truncf %51 : vector<128x8xf32> to vector<128x8xbf16>
    %c0_79 = arith.constant 0 : index
    %c0_80 = arith.constant 0 : index
    %c2 = arith.constant 2 : index
    %c0_81 = arith.constant 0 : index
    %53 = vector.load %arg9[%c0_79, %c0_80, %c2, %c0_81] : memref<2x10x10x8xf32, #tpu.memory_space<vmem>>, vector<2x8x8x8xf32>
    %54 = vector.shape_cast %53 : vector<2x8x8x8xf32> to vector<128x8xf32>
    %55 = arith.truncf %54 : vector<128x8xf32> to vector<128x8xbf16>
    %c0_82 = arith.constant 0 : index
    %c1_83 = arith.constant 1 : index
    %c0_84 = arith.constant 0 : index
    %c0_85 = arith.constant 0 : index
    %56 = vector.load %arg9[%c0_82, %c1_83, %c0_84, %c0_85] : memref<2x10x10x8xf32, #tpu.memory_space<vmem>>, vector<2x8x8x8xf32>
    %57 = vector.shape_cast %56 : vector<2x8x8x8xf32> to vector<128x8xf32>
    %58 = arith.truncf %57 : vector<128x8xf32> to vector<128x8xbf16>
    %c0_86 = arith.constant 0 : index
    %c1_87 = arith.constant 1 : index
    %c1_88 = arith.constant 1 : index
    %c0_89 = arith.constant 0 : index
    %59 = vector.load %arg9[%c0_86, %c1_87, %c1_88, %c0_89] : memref<2x10x10x8xf32, #tpu.memory_space<vmem>>, vector<2x8x8x8xf32>
    %60 = vector.shape_cast %59 : vector<2x8x8x8xf32> to vector<128x8xf32>
    %61 = arith.truncf %60 : vector<128x8xf32> to vector<128x8xbf16>
    %c0_90 = arith.constant 0 : index
    %c1_91 = arith.constant 1 : index
    %c2_92 = arith.constant 2 : index
    %c0_93 = arith.constant 0 : index
    %62 = vector.load %arg9[%c0_90, %c1_91, %c2_92, %c0_93] : memref<2x10x10x8xf32, #tpu.memory_space<vmem>>, vector<2x8x8x8xf32>
    %63 = vector.shape_cast %62 : vector<2x8x8x8xf32> to vector<128x8xf32>
    %64 = arith.truncf %63 : vector<128x8xf32> to vector<128x8xbf16>
    %c0_94 = arith.constant 0 : index
    %c2_95 = arith.constant 2 : index
    %c0_96 = arith.constant 0 : index
    %c0_97 = arith.constant 0 : index
    %65 = vector.load %arg9[%c0_94, %c2_95, %c0_96, %c0_97] : memref<2x10x10x8xf32, #tpu.memory_space<vmem>>, vector<2x8x8x8xf32>
    %66 = vector.shape_cast %65 : vector<2x8x8x8xf32> to vector<128x8xf32>
    %67 = arith.truncf %66 : vector<128x8xf32> to vector<128x8xbf16>
    %c0_98 = arith.constant 0 : index
    %c2_99 = arith.constant 2 : index
    %c1_100 = arith.constant 1 : index
    %c0_101 = arith.constant 0 : index
    %68 = vector.load %arg9[%c0_98, %c2_99, %c1_100, %c0_101] : memref<2x10x10x8xf32, #tpu.memory_space<vmem>>, vector<2x8x8x8xf32>
    %69 = vector.shape_cast %68 : vector<2x8x8x8xf32> to vector<128x8xf32>
    %70 = arith.truncf %69 : vector<128x8xf32> to vector<128x8xbf16>
    %c0_102 = arith.constant 0 : index
    %c2_103 = arith.constant 2 : index
    %c2_104 = arith.constant 2 : index
    %c0_105 = arith.constant 0 : index
    %71 = vector.load %arg9[%c0_102, %c2_103, %c2_104, %c0_105] : memref<2x10x10x8xf32, #tpu.memory_space<vmem>>, vector<2x8x8x8xf32>
    %72 = vector.shape_cast %71 : vector<2x8x8x8xf32> to vector<128x8xf32>
    %73 = arith.truncf %72 : vector<128x8xf32> to vector<128x8xbf16>
    %74 = tpu.concatenate %49, %52, %55, %58, %61, %64, %67, %70, %73 in 1 : vector<128x8xbf16>, vector<128x8xbf16>, vector<128x8xbf16>, vector<128x8xbf16>, vector<128x8xbf16>, vector<128x8xbf16>, vector<128x8xbf16>, vector<128x8xbf16>, vector<128x8xbf16> -> vector<128x72xbf16>
    %c0_106 = arith.constant 0 : index
    %c0_107 = arith.constant 0 : index
    %75 = vector.load %arg5[%c0_106, %c0_107] : memref<72x8xbf16, #tpu.memory_space<vmem>>, vector<72x8xbf16>
    %cst_108 = arith.constant dense<0.000000e+00> : vector<128x8xf32>
    %76 = tpu.matmul %74, %75, %cst_108 {dimension_numbers = #tpu.dot_dimension_numbers<[1], [0], [0], [1], [0, 0, 1, 1], [], []>} : vector<128x72xbf16>, vector<72x8xbf16>, vector<128x8xf32> -> vector<128x8xf32>
    %c0_109 = arith.constant 0 : index
    %c0_110 = arith.constant 0 : index
    %77 = vector.load %arg6[%c0_109, %c0_110] : memref<1x8xf32, #tpu.memory_space<vmem>>, vector<1x8xf32>
    %78 = vector.broadcast %77 : vector<1x8xf32> to vector<128x8xf32>
    %79 = arith.mulf %76, %78 : vector<128x8xf32>
    %c0_111 = arith.constant 0 : index
    %c0_112 = arith.constant 0 : index
    %80 = vector.load %arg7[%c0_111, %c0_112] : memref<1x8xf32, #tpu.memory_space<vmem>>, vector<1x8xf32>
    %81 = vector.broadcast %80 : vector<1x8xf32> to vector<128x8xf32>
    %82 = arith.addf %79, %81 : vector<128x8xf32>
    %c0_113 = arith.constant 0 : index
    %c1_114 = arith.constant 1 : index
    %c1_115 = arith.constant 1 : index
    %c0_116 = arith.constant 0 : index
    %c0_117 = arith.constant 0 : index
    %c0_118 = arith.constant 0 : index
    %83 = vector.load %arg2[%c0_113, %c1_114, %c1_115, %c0_116, %c0_117, %c0_118] : memref<2x2x2x9x9x4xf32, #tpu.memory_space<vmem>>, vector<2x1x1x8x8x4xf32>
    %84 = vector.shape_cast %83 : vector<2x1x1x8x8x4xf32> to vector<2x8x8x4xf32>
    %85 = vector.shape_cast %84 : vector<2x8x8x4xf32> to vector<128x4xf32>
    %cst_119 = arith.constant 0.000000e+00 : f32
    %86 = vector.broadcast %cst_119 : f32 to vector<128x2xf32>
    %cst_120 = arith.constant 0.000000e+00 : f32
    %87 = vector.broadcast %cst_120 : f32 to vector<128x2xf32>
    %88 = tpu.concatenate %86, %85, %87 in 1 : vector<128x2xf32>, vector<128x4xf32>, vector<128x2xf32> -> vector<128x8xf32>
    %89 = arith.addf %82, %88 : vector<128x8xf32>
    %cst_121 = arith.constant 0.000000e+00 : f32
    %90 = vector.broadcast %cst_121 : f32 to vector<128x8xf32>
    %91 = arith.maximumf %90, %89 : vector<128x8xf32>
    %92 = vector.broadcast %1 : f32 to vector<128x8xf32>
    %93 = arith.minimumf %92, %91 : vector<128x8xf32>
    %cst_122 = arith.constant 3.000000e+00 : f32
    %94 = arith.divf %cst_122, %1 : f32
    %95 = vector.broadcast %94 : f32 to vector<128x8xf32>
    %96 = arith.mulf %93, %95 : vector<128x8xf32>
    %97 = math.roundeven %96 : vector<128x8xf32>
    %cst_123 = arith.constant 3.000000e+00 : f32
    %98 = arith.divf %1, %cst_123 : f32
    %99 = vector.broadcast %98 : f32 to vector<128x8xf32>
    %100 = arith.mulf %97, %99 : vector<128x8xf32>
    %101 = vector.shape_cast %100 : vector<128x8xf32> to vector<2x64x8xf32>
    %c0_124 = arith.constant 0 : index
    %c0_125 = arith.constant 0 : index
    %c0_126 = arith.constant 0 : index
    %102 = vector.load %arg8[%c0_124, %c0_125, %c0_126] : memref<2x64x8xf32, #tpu.memory_space<vmem>>, vector<2x64x8xf32>
    tpu.vector_store %arg8[%c0_124, %c0_125, %c0_126], %101 {strides = array<i32>} : memref<2x64x8xf32, #tpu.memory_space<vmem>>, vector<2x64x8xf32>,
    return
  }
  func.func @transform_0(%arg0: i32) -> (i32, i32) {
    %c0_i32 = arith.constant 0 : i32
    %c0_i32_0 = arith.constant 0 : i32
    %c0_i32_1 = arith.constant 0 : i32
    return %c0_i32, %c0_i32_0 : i32, i32
  }
  func.func @transform_1(%arg0: i32) -> (i32, i32, i32, i32, i32, i32) {
    %c0_i32 = arith.constant 0 : i32
    %c0_i32_0 = arith.constant 0 : i32
    %c0_i32_1 = arith.constant 0 : i32
    %c0_i32_2 = arith.constant 0 : i32
    %c0_i32_3 = arith.constant 0 : i32
    %c0_i32_4 = arith.constant 0 : i32
    return %arg0, %c0_i32, %c0_i32_0, %c0_i32_1, %c0_i32_2, %c0_i32_3 : i32, i32, i32, i32, i32, i32
  }
  func.func @transform_2(%arg0: i32) -> (i32, i32) {
    %c0_i32 = arith.constant 0 : i32
    %c0_i32_0 = arith.constant 0 : i32
    %c0_i32_1 = arith.constant 0 : i32
    return %c0_i32, %c0_i32_0 : i32, i32
  }
  func.func @transform_3(%arg0: i32) -> (i32, i32) {
    %c0_i32 = arith.constant 0 : i32
    %c0_i32_0 = arith.constant 0 : i32
    %c0_i32_1 = arith.constant 0 : i32
    return %c0_i32, %c0_i32_0 : i32, i32
  }
  func.func @transform_4(%arg0: i32) -> (i32, i32) {
    %c0_i32 = arith.constant 0 : i32
    %c0_i32_0 = arith.constant 0 : i32
    %c0_i32_1 = arith.constant 0 : i32
    return %c0_i32, %c0_i32_0 : i32, i32
  }
  func.func @transform_5(%arg0: i32) -> (i32, i32) {
    %c0_i32 = arith.constant 0 : i32
    %c0_i32_0 = arith.constant 0 : i32
    %c0_i32_1 = arith.constant 0 : i32
    return %c0_i32, %c0_i32_0 : i32, i32
  }
  func.func @transform_6(%arg0: i32) -> (i32, i32) {
    %c0_i32 = arith.constant 0 : i32
    %c0_i32_0 = arith.constant 0 : i32
    %c0_i32_1 = arith.constant 0 : i32
    return %c0_i32, %c0_i32_0 : i32, i32
  }
  func.func @transform_7(%arg0: i32) -> (i32, i32, i32) {
    %c0_i32 = arith.constant 0 : i32
    %c0_i32_0 = arith.constant 0 : i32
    %c0_i32_1 = arith.constant 0 : i32
    return %arg0, %c0_i32, %c0_i32_0 : i32, i32, i32
  }
}

</mosaic_0001>

<bundles_post_ra>
// kernel: tpu_custom_call.1
= control target key start
LH: loop header
LB: loop body
LE: loop exit
PB: predicated region body
PF: predicated region fallthrough
CT: control target
= control target key end

     0   :  { %12 = vsyncpa [#allocation4], 0  ;;  %s4162_s0 = inlined_call_operand.vmem [shape: f32[1,2], index: 0, kind: input, shape index: {}]   ;;  %s4163_s1 = inlined_call_operand.vmem [shape: f32[2,2,2,9,9,4], index: 1, kind: input, shape index: {}]   ;;  %s4164_s2 = inlined_call_operand.vmem [shape: f32[36,8], index: 2, kind: input, shape index: {}]   ;;  %s4165_s3 = inlined_call_operand.vmem [shape: f32[1,8], index: 3, kind: input, shape index: {}]   ;;  %s4166_s4 = inlined_call_operand.vmem [shape: bf16[72,8], index: 4, kind: input, shape index: {}]   ;;  %s4167_s5 = inlined_call_operand.vmem [shape: f32[1,8], index: 5, kind: input, shape index: {}]   ;;  %s4168_s6 = inlined_call_operand.vmem [shape: f32[1,8], index: 6, kind: input, shape index: {}]   ;;  %s4169_s7 = inlined_call_operand.vmem [shape: f32[2,64,8], index: 7, kind: output, shape index: {}]  }
   0x1   :  { %s19_s26 = sshll.u32 %s4162_s0, 4  ;;  %s20_s26 = int_to_ptr.vmem [resolvable:$true] %s19_s26 }
   0x2   :  { %s2707_s27 = scalar_lea.vmem %s20_s26, 16  ;;  %p2712_p1 = scmp.lt.s32.totalorder %s20_s26, %s20_s26 }
   0x3   :  { %p2708_p0 = scmp.ne.s32.totalorder %s20_s26, %s2707_s27  ;;  %p2713_p2 = scmp.lt.s32.totalorder %s2707_s27, %s2707_s27 }
   0x5   :  { %p2714_p3 = por %p2713_p2, %p2712_p1 }
   0x7   :  { %p2715_p4 = pnand %p2714_p3, %p2708_p0 }
   0x9   :  { %2718 = shalt.err (!%p2715_p4)
}
   0xa   :  { %s2721_s28 = smov [#allocation3]  }
   0xb   :  { %22 = dma.vmem_to_smem %s20_s26, 16, %s2721_s28, [#allocation4]  }
   0xc   :  { %2719 = dma.done.wait [#allocation4], 16  }
   0xd   :  { %2720 = vsyncadd [#allocation4], 4294967280 }
   0xe   :  { %38 = sfence }
   0xf   :  { %v75_v0 = vld [vmem:[%s4163_s1 + $0x1] sm:$0xff]  ;;  %v2167_v1 = vld [vmem:[%s4163_s1 + $0x90] sm:$0xff]  ;;  %s2722_s0 = smov 8   ;;  %s2723_s10 = smov 4   ;;  %vm900_vm0 = vcmask 1043456   ;;  %v842_v17 = vld [vmem:[%s4164_s2 + $0x18] sm:$0xff] }
  0x10   :  { %271 = vrot.lane.b32.xlu1 %v75_v0, %s2722_s0  ;;  %207 = vrot.lane.b32.xlu0 %v2167_v1, %s2723_s10  ;;  %v76_v2 = vld [vmem:[%s4163_s1 + $0x11] sm:$0xff]  ;;  %v2168_v3 = vld [vmem:[%s4163_s1 + $0xa0] sm:$0xff]  ;;  %s2724_s19 = smov 12   ;;  %s2725_s24 = smov 16   ;;  %vm703_vm1 = vcmask 31744   ;;  %vm720_vm2 = vcmask 64512  }
  0x11   :  { %v2184_v4 = vld [vmem:[%s4163_s1 + $0x130] sm:$0xff]  ;;  %v2183_v5 = vld [vmem:[%s4163_s1 + $0x120] sm:$0xff]  ;;  %s2726_s29 = smov 20   ;;  %s2727_s21 = smov 24   ;;  %v840_v20 = vld [vmem:[%s4164_s2 + $0x8] sm:$0xff]  ;;  %vm737_vm3 = vcmask 97280  }
  0x12   :  { %v2169_v6 = vld [vmem:[%s4163_s1 + $0xb0] sm:$0xff]  ;;  %v2215_v8 = vld [vmem:[%s4163_s1 + $0x121] sm:$0xff]  ;;  %s2728_s12 = smov 28   ;;  %s2729_s20 = smov 32   ;;  %vm754_vm4 = vcmask 130048   ;;  %vm771_vm5 = vcmask 162816  }
  0x13   :  { %v2199_v7 = vld [vmem:[%s4163_s1 + $0x1b0] sm:$0xff]  ;;  %v2200_v9 = vld [vmem:[%s4163_s1 + $0x1c0] sm:$0xff]  ;;  %vm788_vm6 = vcmask 195584   ;;  %vm805_vm7 = vcmask 228352   ;;  %vm822_vm8 = vcmask 261120   ;;  %vm851_vm9 = vcmask 293888  }
  0x14   :  { %273 = vrot.lane.b32.xlu1 %v76_v2, %s2722_s0  ;;  %209 = vrot.lane.b32.xlu0 %v2168_v3, %s2723_s10  ;;  %v77_v10 = vld [vmem:[%s4163_s1 + $0x21] sm:$0xff]  ;;  %v2830_v12 = vld [vmem:[%s4163_s1 + $0x10] sm:$0xff]  ;;  %s40_s22 = sld [smem:[#allocation3]]  ;;  %vm1120_vm10 = vcmask 58368   ;;  %s2732_s15 = smov 48  }
  0x15   :  { %v2170_v11 = vld [vmem:[%s4163_s1 + $0xc0] sm:$0xff]  ;;  %v2216_v13 = vld [vmem:[%s4163_s1 + $0x131] sm:$0xff]  ;;  %s2733_s16 = smov 56  }
  0x16   :  { %v2185_v14 = vld [vmem:[%s4163_s1 + $0x140] sm:$0xff]  ;;  %v78_v15 = vld [vmem:[%s4163_s1 + $0x31] sm:$0xff] }
  0x17   :  { %v843_v16 = vld [vmem:[%s4164_s2 + $0x20] sm:$0xf]  ;;  %v841_v19 = vld [vmem:[%s4164_s2 + $0x10] sm:$0xff] }
  0x18   :  { %337 = vrot.lane.b32.xlu1 %v2184_v4, %s2724_s19  ;;  %335 = vrot.lane.b32.xlu0 %v2183_v5, %s2724_s19  ;;  %v2857_v18 = vld [vmem:[%s4163_s1 + $0x20] sm:$0xff]  ;;  %v2201_v21 = vld [vmem:[%s4163_s1 + $0x1d0] sm:$0xff] }
  0x19   :  { %2362 = vmatprep.subr.msk.mxu0 %vm900_vm0, %v843_v16  ;;  %v2186_v22 = vld [vmem:[%s4163_s1 + $0x150] sm:$0xff]  ;;  %v839_v23 = vld [vmem:[%s4164_s2] sm:$0xff] }
  0x1a   :  { %2363 = vmatpush3.msk.msra.mxu0 %vm900_vm0, %v843_v16  ;;  %v2202_v24 = vld [vmem:[%s4163_s1 + $0x1e0] sm:$0xff]  ;;  %v2171_v25 = vld [vmem:[%s4163_s1 + $0xd0] sm:$0xff] }
  0x1b   :  { %2364 = vmatprep.subr.mxu0 %v842_v17  ;;  %v2217_v26 = vld [vmem:[%s4163_s1 + $0x141] sm:$0xff]  ;;  %v2905_v29 = vld [vmem:[%s4163_s1 + $0x30] sm:$0xff] }
  0x1c   :  { %211 = vrot.lane.b32.xlu1 %v2169_v6, %s2723_s10  ;;  %399 = vrot.lane.b32.xlu0 %v2199_v7, %s2725_s24  ;;  %v79_v27 = vld [vmem:[%s4163_s1 + $0x41] sm:$0xff]  ;;  %v2218_v30 = vld [vmem:[%s4163_s1 + $0x151] sm:$0xff] }
  0x1d   :  { %2365 = vmatpush3.msra.mxu0 %v842_v17  ;;  %v2172_v28 = vld [vmem:[%s4163_s1 + $0xe0] sm:$0xff]  ;;  %v80_v32 = vld [vmem:[%s4163_s1 + $0x51] sm:$0xff] }
  0x1e   :  { %2366 = vmatprep.subr.mxu0 %v841_v19  ;;  %v2187_v31 = vld [vmem:[%s4163_s1 + $0x160] sm:$0xff]  ;;  %v2203_v34 = vld [vmem:[%s4163_s1 + $0x1f0] sm:$0xff] }
  0x1f   :  { %2367 = vmatpush3.msra.mxu0 %v841_v19  ;;  %v2924_v33 = vld [vmem:[%s4163_s1 + $0x40] sm:$0xff]  ;;  %v2188_v35 = vld [vmem:[%s4163_s1 + $0x170] sm:$0xff] }
  0x20   :  { %463 = vrot.lane.b32.xlu1 %v2215_v8, %s2726_s29  ;;  %401 = vrot.lane.b32.xlu0 %v2200_v9, %s2725_s24  ;;  %v2204_v36 = vld [vmem:[%s4163_s1 + $0x200] sm:$0xff]  ;;  %v2173_v37 = vld [vmem:[%s4163_s1 + $0xf0] sm:$0xff] }
  0x21   :  { %2368 = vmatprep.subr.mxu0 %v840_v20  ;;  %v2219_v38 = vld [vmem:[%s4163_s1 + $0x161] sm:$0xff]  ;;  %v2963_v41 = vld [vmem:[%s4163_s1 + $0x50] sm:$0xff] }
  0x22   :  { %2369 = vmatpush3.msra.mxu0 %v840_v20  ;;  %v81_v39 = vld [vmem:[%s4163_s1 + $0x61] sm:$0xff]  ;;  %v2220_v42 = vld [vmem:[%s4163_s1 + $0x171] sm:$0xff] }
  0x23   :  { %2370 = vmatprep.subr.mxu0 %v839_v23  ;;  %v2174_v40 = vld [vmem:[%s4163_s1 + $0x100] sm:$0xff]  ;;  %v82_v44 = vld [vmem:[%s4163_s1 + $0x71] sm:$0xff] }
  0x24   :  { %275 = vrot.lane.b32.xlu1 %v77_v10, %s2722_s0  ;;  %213 = vrot.lane.b32.xlu0 %v2170_v11, %s2723_s10  ;;  %v2189_v43 = vld [vmem:[%s4163_s1 + $0x180] sm:$0xff]  ;;  %v2205_v46 = vld [vmem:[%s4163_s1 + $0x210] sm:$0xff] }
  0x25   :  { %2371 = vmatpush3.msra.mxu0 %v839_v23  ;;  %v2982_v45 = vld [vmem:[%s4163_s1 + $0x60] sm:$0xff]  ;;  %v2190_v47 = vld [vmem:[%s4163_s1 + $0x190] sm:$0xff] }
  0x26   :  { %v2206_v48 = vld [vmem:[%s4163_s1 + $0x220] sm:$0xff]  ;;  %v2175_v49 = vld [vmem:[%s4163_s1 + $0x2d0] sm:$0xff] }
  0x27   :  { %v2221_v50 = vld [vmem:[%s4163_s1 + $0x181] sm:$0xff]  ;;  %v3024_v55 = vld [vmem:[%s4163_s1 + $0x70] sm:$0xff] }
  0x28   :  { %527 = vrot.lane.b32.xlu1 %v2830_v12, %s2727_s21  ;;  %465 = vrot.lane.b32.xlu0 %v2216_v13, %s2726_s29  ;;  %v83_v51 = vld [vmem:[%s4163_s1 + $0x241] sm:$0xff]  ;;  %v2222_v56 = vld [vmem:[%s4163_s1 + $0x191] sm:$0xff] }
  0x29   :  { %v3016_v52 = vld [vmem:[%s4163_s1 + $0x2e0] sm:$0xff]  ;;  %v3042_v60 = vld [vmem:[%s4163_s1 + $0x251] sm:$0xff] }
  0x2a   :  { %v2191_v59 = vld [vmem:[%s4163_s1 + $0x360] sm:$0xff] }
  0x2b   :  { %v2238_v63 = vld [vmem:[%s4163_s1 + $0x80] sm:$0xff] }
  0x2c   :  { %339 = vrot.lane.b32.xlu1 %v2185_v14, %s2724_s19  ;;  %277 = vrot.lane.b32.xlu0 %v78_v15, %s2722_s0  ;;  %v2208_v9 = vld [vmem:[%s4163_s1 + $0x400] sm:$0xff] }
  0x2d   :  { %v2270_v14 = vld [vmem:[%s4163_s1 + $0x81] sm:$0xff] }
  0x2e   :  { %v42_v19 = vld [vmem:[%s4163_s1] sm:$0xff] }
  0x2f   :  { %v3104_v20 = vld [vmem:[%s4163_s1 + $0x261] sm:$0xff] }
  0x30   :  { %591 = vrot.lane.b32.xlu1 %v2168_v3, %s2728_s12  ;;  %529 = vrot.lane.b32.xlu0 %v2857_v18, %s2727_s21  ;;  %v2192_v3 = vld [vmem:[%s4163_s1 + $0x370] sm:$0xff] }
  0x34   :  { %403 = vrot.lane.b32.xlu1 %v2201_v21, %s2725_s24  ;;  %341 = vrot.lane.b32.xlu0 %v2186_v22, %s2724_s19  ;;  %v3109_v21 = vld [vmem:[%s4163_s1 + $0x300] sm:$0xff] }
  0x38   :  { %655 = vrot.lane.b32.xlu1 %v76_v2, %s2729_s20  ;;  %593 = vrot.lane.b32.xlu0 %v2169_v6, %s2728_s12  ;;  %v2207_v2 = vld [vmem:[%s4163_s1 + $0x3f0] sm:$0xff] }
  0x39   :  { %v2254_v6 = vld [vmem:[%s4163_s1 + $0x110] sm:$0xff] }
  0x3c   :  { %405 = vrot.lane.b32.xlu1 %v2202_v24, %s2725_s24  ;;  %215 = vrot.lane.b32.xlu0 %v2171_v25, %s2723_s10 }
  0x40   :  { %657 = vrot.lane.b32.xlu1 %v77_v10, %s2729_s20  ;;  %467 = vrot.lane.b32.xlu0 %v2217_v26, %s2726_s29  ;;  %v3081_v10 = vld [vmem:[%s4163_s1 + $0x2f0] sm:$0xff] }
  0x41   :  { %v3120_v26 = vld [vmem:[%s4163_s1 + $0x250] sm:$0xff] }
  0x44   :  { %279 = vrot.lane.b32.xlu1 %v79_v27, %s2722_s0  ;;  %217 = vrot.lane.b32.xlu0 %v2172_v28, %s2723_s10 }
  0x48   :  { %531 = vrot.lane.b32.xlu1 %v2905_v29, %s2727_s21  ;;  %469 = vrot.lane.b32.xlu0 %v2218_v30, %s2726_s29 }
  0x4c   :  { %343 = vrot.lane.b32.xlu1 %v2187_v31, %s2724_s19  ;;  %281 = vrot.lane.b32.xlu0 %v80_v32, %s2722_s0 }
  0x50   :  { %595 = vrot.lane.b32.xlu1 %v2170_v11, %s2728_s12  ;;  %533 = vrot.lane.b32.xlu0 %v2924_v33, %s2727_s21 }
  0x54   :  { %407 = vrot.lane.b32.xlu1 %v2203_v34, %s2725_s24  ;;  %345 = vrot.lane.b32.xlu0 %v2188_v35, %s2724_s19 }
  0x58   :  { %659 = vrot.lane.b32.xlu1 %v78_v15, %s2729_s20  ;;  %597 = vrot.lane.b32.xlu0 %v2171_v25, %s2728_s12  ;;  %v2223_v15 = vld [vmem:[%s4163_s1 + $0x361] sm:$0xff] }
  0x5c   :  { %409 = vrot.lane.b32.xlu1 %v2204_v36, %s2725_s24  ;;  %219 = vrot.lane.b32.xlu0 %v2173_v37, %s2723_s10  ;;  %v2193_v36 = vld [vmem:[%s4163_s1 + $0x380] sm:$0xff] }
  0x60   :  { %661 = vrot.lane.b32.xlu1 %v79_v27, %s2729_s20  ;;  %471 = vrot.lane.b32.xlu0 %v2219_v38, %s2726_s29  ;;  %v2224_v27 = vld [vmem:[%s4163_s1 + $0x371] sm:$0xff] }
  0x64   :  { %283 = vrot.lane.b32.xlu1 %v81_v39, %s2722_s0  ;;  %221 = vrot.lane.b32.xlu0 %v2174_v40, %s2723_s10 }
  0x68   :  { %535 = vrot.lane.b32.xlu1 %v2963_v41, %s2727_s21  ;;  %473 = vrot.lane.b32.xlu0 %v2220_v42, %s2726_s29 }
  0x6c   :  { %347 = vrot.lane.b32.xlu1 %v2189_v43, %s2724_s19  ;;  %285 = vrot.lane.b32.xlu0 %v82_v44, %s2722_s0 }
  0x70   :  { %599 = vrot.lane.b32.xlu1 %v2172_v28, %s2728_s12  ;;  %537 = vrot.lane.b32.xlu0 %v2982_v45, %s2727_s21 }
  0x74   :  { %411 = vrot.lane.b32.xlu1 %v2205_v46, %s2725_s24  ;;  %349 = vrot.lane.b32.xlu0 %v2190_v47, %s2724_s19 }
  0x78   :  { %663 = vrot.lane.b32.xlu1 %v80_v32, %s2729_s20  ;;  %601 = vrot.lane.b32.xlu0 %v2173_v37, %s2728_s12  ;;  %v3142_v37 = vld [vmem:[%s4163_s1 + $0x271] sm:$0xff] }
  0x7c   :  { %413 = vrot.lane.b32.xlu1 %v2206_v48, %s2725_s24  ;;  %223 = vrot.lane.b32.xlu0 %v2175_v49, %s2723_s10 }
  0x80   :  { %665 = vrot.lane.b32.xlu1 %v81_v39, %s2729_s20  ;;  %475 = vrot.lane.b32.xlu0 %v2221_v50, %s2726_s29 }
  0x82   :  { %v272_v53 = vpop.permute.xlu1 %271  ;;  %v208_v54 = vpop.permute.xlu0 %207 }
  0x83   :  { %v704_v22 = vsel %vm703_vm1, %v42_v19, %v208_v54  ;;  %v2194_v54 = vld [vmem:[%s4163_s1 + $0x390] sm:$0xff] }
  0x84   :  { %287 = vrot.lane.b32.xlu1 %v83_v51, %s2722_s0  ;;  %225 = vrot.lane.b32.xlu0 %v3016_v52, %s2723_s10  ;;  %v721_v25 = vsel %vm720_vm2, %v704_v22, %v272_v53  ;;  %v2209_v53 = vld [vmem:[%s4163_s1 + $0x410] sm:$0xff] }
  0x85   :  { %v2226_v19 = vld [vmem:[%s4163_s1 + $0x391] sm:$0xff] }
  0x86   :  { %v3029_v57 = vpop.permute.xlu1 %273  ;;  %v3031_v58 = vpop.permute.xlu0 %209 }
  0x87   :  { %v705_v38 = vsel %vm703_vm1, %v2830_v12, %v3031_v58  ;;  %v3158_v12 = vld [vmem:[%s4163_s1 + $0x260] sm:$0xff] }
  0x88   :  { %539 = vrot.lane.b32.xlu1 %v3024_v55, %s2727_s21  ;;  %477 = vrot.lane.b32.xlu0 %v2222_v56, %s2726_s29 }
  0x8a   :  { %v3044_v61 = vpop.permute.xlu1 %337  ;;  %v336_v62 = vpop.permute.xlu0 %335 }
  0x8b   :  { %v738_v28 = vsel %vm737_vm3, %v721_v25, %v336_v62  ;;  %v3193_v62 = vstv %s40_s22  ;;  %v3257_v25 = vld [vmem:[%s4163_s1 + $0x291] sm:$0xff]  ;;  %s2734_s22 = smov 64  }
  0x8c   :  { %351 = vrot.lane.b32.xlu1 %v2191_v59, %s2724_s19  ;;  %289 = vrot.lane.b32.xlu0 %v3042_v60, %s2722_s0  ;;  %2703 = vrcp.f32 %v3193_v62 }
  0x8e   :  { %v3052_v0 = vpop.permute.xlu1 %211  ;;  %v400_v1 = vpop.permute.xlu0 %399 }
  0x8f   :  { %v755_v32 = vsel %vm754_vm4, %v738_v28, %v400_v1  ;;  %v2179_v1 = vld [vmem:[%s4163_s1 + $0x310] sm:$0xff] }
  0x90   :  { %603 = vrot.lane.b32.xlu1 %v2174_v40, %s2728_s12  ;;  %541 = vrot.lane.b32.xlu0 %v2238_v63, %s2727_s21  ;;  %v2210_v63 = vld [vmem:[%s4163_s1 + $0x420] sm:$0xff] }
  0x92   :  { %v464_v4 = vpop.permute.xlu1 %463  ;;  %v3062_v5 = vpop.permute.xlu0 %401 }
  0x93   :  { %v772_v34 = vsel %vm771_vm5, %v755_v32, %v464_v4 }
  0x94   :  { %415 = vrot.lane.b32.xlu1 %v2207_v2, %s2725_s24  ;;  %353 = vrot.lane.b32.xlu0 %v2192_v3, %s2724_s19 }
  0x96   :  { %v3069_v7 = vpop.permute.xlu1 %275  ;;  %v3071_v8 = vpop.permute.xlu0 %213 }
  0x98   :  { %667 = vrot.lane.b32.xlu1 %v82_v44, %s2729_s20  ;;  %605 = vrot.lane.b32.xlu0 %v2254_v6, %s2728_s12  ;;  %v722_v44 = vsel %vm720_vm2, %v705_v38, %v3029_v57  ;;  %v87_v6 = vld [vmem:[%s4163_s1 + $0x281] sm:$0xff] }
  0x99   :  { %v739_v46 = vsel %vm737_vm3, %v722_v44, %v3044_v61 }
  0x9a   :  { %v528_v11 = vpop.permute.xlu1 %527  ;;  %v466_v13 = vpop.permute.xlu0 %465  ;;  %v756_v49 = vsel %vm754_vm4, %v739_v46, %v3062_v5 }
  0x9b   :  { %v789_v35 = vsel %vm788_vm6, %v772_v34, %v528_v11  ;;  %v773_v50 = vsel %vm771_vm5, %v756_v49, %v466_v13  ;;  %v706_v13 = vsel %vm703_vm1, %v2857_v18, %v3052_v0  ;;  %v707_v34 = vsel %vm703_vm1, %v2905_v29, %v3071_v8 }
  0x9c   :  { %417 = vrot.lane.b32.xlu1 %v2208_v9, %s2725_s24  ;;  %227 = vrot.lane.b32.xlu0 %v3081_v10, %s2723_s10  ;;  %v3220_v9 = vld [vmem:[%s4163_s1 + $0x320] sm:$0xff] }
  0x9e   :  { %v3092_v16 = vpop.permute.xlu1 %339  ;;  %v3094_v17 = vpop.permute.xlu0 %277 }
  0xa0   :  { %669 = vrot.lane.b32.xlu1 %v2270_v14, %s2729_s20  ;;  %479 = vrot.lane.b32.xlu0 %v2223_v15, %s2726_s29  ;;  %v723_v14 = vsel %vm720_vm2, %v706_v13, %v3069_v7  ;;  %v3233_v15 = vld [vmem:[%s4163_s1 + $0x270] sm:$0xff] }
  0xa1   :  { %v740_v18 = vsel %vm737_vm3, %v723_v14, %v3092_v16  ;;  %v2195_v16 = vld [vmem:[%s4163_s1 + $0x3a0] sm:$0xff]  ;;  %v3367_v14 = vld [vmem:[%s4163_s1 + $0x2b1] sm:$0xff] }
  0xa2   :  { %v592_v23 = vpop.permute.xlu1 %591  ;;  %v530_v24 = vpop.permute.xlu0 %529 }
  0xa3   :  { %v806_v39 = vsel %vm805_vm7, %v789_v35, %v592_v23  ;;  %v790_v51 = vsel %vm788_vm6, %v773_v50, %v530_v24  ;;  %v724_v35 = vsel %vm720_vm2, %v707_v34, %v3094_v17  ;;  %v2212_v50 = vld [vmem:[%s4163_s1 + $0x440] sm:$0xff] }
  0xa4   :  { %291 = vrot.lane.b32.xlu1 %v3104_v20, %s2722_s0  ;;  %229 = vrot.lane.b32.xlu0 %v3109_v21, %s2723_s10 }
  0xa6   :  { %v3126_v30 = vpop.permute.xlu1 %403  ;;  %v3128_v31 = vpop.permute.xlu0 %341 }
  0xa7   :  { %v757_v7 = vsel %vm754_vm4, %v740_v18, %v3126_v30  ;;  %v741_v38 = vsel %vm737_vm3, %v724_v35, %v3128_v31  ;;  %v2211_v31 = vld [vmem:[%s4163_s1 + $0x430] sm:$0xff] }
  0xa8   :  { %543 = vrot.lane.b32.xlu1 %v3120_v26, %s2727_s21  ;;  %481 = vrot.lane.b32.xlu0 %v2224_v27, %s2726_s29 }
  0xaa   :  { %v656_v40 = vpop.permute.xlu1 %655  ;;  %v594_v42 = vpop.permute.xlu0 %593 }
  0xab   :  { %v823_v43 = vsel %vm822_vm8, %v806_v39, %v656_v40  ;;  %v807_v56 = vsel %vm805_vm7, %v790_v51, %v594_v42  ;;  %v2196_v42 = vld [vmem:[%s4163_s1 + $0x3b0] sm:$0xff] }
  0xac   :  { %355 = vrot.lane.b32.xlu1 %v2193_v36, %s2724_s19  ;;  %293 = vrot.lane.b32.xlu0 %v3142_v37, %s2722_s0  ;;  %v3273_v36 = vld [vmem:[%s4163_s1 + $0x280] sm:$0xff]  ;;  %v2181_v51 = vld [vmem:[%s4163_s1 + $0x330] sm:$0xff] }
  0xad   :  { %2372 = vmatprep.mubr.msk.f32.mxu0 %vm851_vm9, %v823_v43 }
  0xae   :  { %v3162_v47 = vpop.permute.xlu1 %405  ;;  %v3164_v48 = vpop.permute.xlu0 %215 }
  0xaf   :  { %v758_v8 = vsel %vm754_vm4, %v741_v38, %v3162_v47 }
  0xb0   :  { %607 = vrot.lane.b32.xlu1 %v3016_v52, %s2728_s12  ;;  %545 = vrot.lane.b32.xlu0 %v3158_v12, %s2727_s21 }
  0xb2   :  { %v658_v57 = vpop.permute.xlu1 %657  ;;  %v468_v58 = vpop.permute.xlu0 %467 }
  0xb3   :  { %v824_v52 = vsel %vm822_vm8, %v807_v56, %v658_v57  ;;  %v774_v23 = vsel %vm771_vm5, %v757_v7, %v468_v58  ;;  %v89_v58 = vld [vmem:[%s4163_s1 + $0x2a1] sm:$0xff] }
  0xb4   :  { %419 = vrot.lane.b32.xlu1 %v2209_v53, %s2725_s24  ;;  %357 = vrot.lane.b32.xlu0 %v2194_v54, %s2724_s19 }
  0xb5   :  { %2373 = vmatmul.mubr.msk.f32.vlgmr.msra.gmra.mxu0 %vm851_vm9, %v824_v52  ;;  %v3330_v52 = vld [vmem:[%s4163_s1 + $0x340] sm:$0xff] }
  0xb6   :  { %v3185_v59 = vpop.permute.xlu1 %279  ;;  %v3187_v61 = vpop.permute.xlu0 %217 }
  0xb7   :  { %v709_v7 = vsel %vm703_vm1, %v2963_v41, %v3187_v61 }
  0xb8   :  { %671 = vrot.lane.b32.xlu1 %v3042_v60, %s2729_s20  ;;  %609 = vrot.lane.b32.xlu0 %v3081_v10, %s2728_s12  ;;  %v2225_v60 = vld [vmem:[%s4163_s1 + $0x381] sm:$0xff] }
  0xba   :  { %v532_v2 = vpop.permute.xlu1 %531  ;;  %v470_v3 = vpop.permute.xlu0 %469 }
  0xbb   :  { %v791_v24 = vsel %vm788_vm6, %v774_v23, %v532_v2  ;;  %v775_v40 = vsel %vm771_vm5, %v758_v8, %v470_v3  ;;  %v708_v2 = vsel %vm703_vm1, %v2924_v33, %v3164_v48  ;;  %v2229_v8 = vld [vmem:[%s4163_s1 + $0x3c1] sm:$0xff] }
  0xbc   :  { %421 = vrot.lane.b32.xlu1 %v2210_v63, %s2725_s24  ;;  %231 = vrot.lane.b32.xlu0 %v2179_v1, %s2723_s10  ;;  %v725_v3 = vsel %vm720_vm2, %v708_v2, %v3185_v59 }
  0xbe   :  { %v3207_v4 = vpop.permute.xlu1 %343  ;;  %v3209_v5 = vpop.permute.xlu0 %281 }
  0xbf   :  { %v742_v33 = vsel %vm737_vm3, %v725_v3, %v3207_v4  ;;  %v2197_v4 = vld [vmem:[%s4163_s1 + $0x3c0] sm:$0xff]  ;;  %v726_v23 = vsel %vm720_vm2, %v709_v7, %v3209_v5 }
  0xc0   :  { %673 = vrot.lane.b32.xlu1 %v3104_v20, %s2729_s20  ;;  %483 = vrot.lane.b32.xlu0 %v2225_v60, %s2726_s29  ;;  %v2704_v20 = vpop.eup %2703  ;;  %v3343_v60 = vld [vmem:[%s4163_s1 + $0x290] sm:$0xff] }
  0xc1   :  { %2423 = vpush %v2704_v20 }
  0xc2   :  { %v596_v10 = vpop.permute.xlu1 %595  ;;  %v534_v11 = vpop.permute.xlu0 %533 }
  0xc3   :  { %v808_v27 = vsel %vm805_vm7, %v791_v24, %v596_v10  ;;  %v792_v17 = vsel %vm788_vm6, %v775_v40, %v534_v11  ;;  %v3383_v24 = vld [vmem:[%s4163_s1 + $0x2a0] sm:$0xff] }
  0xc4   :  { %295 = vrot.lane.b32.xlu1 %v87_v6, %s2722_s0  ;;  %233 = vrot.lane.b32.xlu0 %v3220_v9, %s2723_s10  ;;  %v2214_v40 = vld [vmem:[%s4163_s1 + $0x460] sm:$0xff] }
  0xc6   :  { %v3240_v0 = vpop.permute.xlu1 %407  ;;  %v3242_v22 = vpop.permute.xlu0 %345 }
  0xc7   :  { %v759_v11 = vsel %vm754_vm4, %v742_v33, %v3240_v0 }
  0xc8   :  { %547 = vrot.lane.b32.xlu1 %v3233_v15, %s2727_s21  ;;  %485 = vrot.lane.b32.xlu0 %v2226_v19, %s2726_s29 }
  0xca   :  { %v660_v28 = vpop.permute.xlu1 %659  ;;  %v598_v30 = vpop.permute.xlu0 %597 }
  0xcb   :  { %v825_v32 = vsel %vm822_vm8, %v808_v27, %v660_v28  ;;  %v809_v43 = vsel %vm805_vm7, %v792_v17, %v598_v30  ;;  %v2198_v30 = vld [vmem:[%s4163_s1 + $0x3d0] sm:$0xff] }
  0xcc   :  { %359 = vrot.lane.b32.xlu1 %v2195_v16, %s2724_s19  ;;  %297 = vrot.lane.b32.xlu0 %v3257_v25, %s2722_s0  ;;  %v743_v16 = vsel %vm737_vm3, %v726_v23, %v3242_v22  ;;  %v2213_v22 = vld [vmem:[%s4163_s1 + $0x450] sm:$0xff] }
  0xcd   :  { %2375 = vmatprep.mubr.msk.f32.mxu0 %vm851_vm9, %v825_v32 }
  0xce   :  { %v3277_v39 = vpop.permute.xlu1 %409  ;;  %v3279_v29 = vpop.permute.xlu0 %219 }
  0xcf   :  { %v760_v61 = vsel %vm754_vm4, %v743_v16, %v3277_v39 }
  0xd0   :  { %611 = vrot.lane.b32.xlu1 %v3109_v21, %s2728_s12  ;;  %549 = vrot.lane.b32.xlu0 %v3273_v36, %s2727_s21 }
  0xd2   :  { %v662_v44 = vpop.permute.xlu1 %661  ;;  %v472_v46 = vpop.permute.xlu0 %471 }
  0xd3   :  { %v826_v47 = vsel %vm822_vm8, %v809_v43, %v662_v44  ;;  %v776_v59 = vsel %vm771_vm5, %v759_v11, %v472_v46  ;;  %v2246_v44 = vld [vmem:[%s4163_s1 + $0x2c0] sm:$0xff]  ;;  %v3446_v46 = vld [vmem:[%s4163_s1 + $0x2b0] sm:$0xff] }
  0xd4   :  { %423 = vrot.lane.b32.xlu1 %v2211_v31, %s2725_s24  ;;  %361 = vrot.lane.b32.xlu0 %v2196_v42, %s2724_s19 }
  0xd5   :  { %2376 = vmatmul.mubr.msk.f32.gmra.mxu0 %vm851_vm9, %v826_v47 }
  0xd6   :  { %v3300_v21 = vpop.permute.xlu1 %283  ;;  %v3302_v49 = vpop.permute.xlu0 %221 }
  0xd8   :  { %675 = vrot.lane.b32.xlu1 %v3142_v37, %s2729_s20  ;;  %613 = vrot.lane.b32.xlu0 %v2179_v1, %s2728_s12  ;;  %v2227_v37 = vld [vmem:[%s4163_s1 + $0x3a1] sm:$0xff] }
  0xda   :  { %v536_v53 = vpop.permute.xlu1 %535  ;;  %v474_v54 = vpop.permute.xlu0 %473 }
  0xdb   :  { %v793_v13 = vsel %vm788_vm6, %v776_v59, %v536_v53  ;;  %v777_v28 = vsel %vm771_vm5, %v760_v61, %v474_v54  ;;  %v2262_v54 = vld [vmem:[%s4163_s1 + $0x350] sm:$0xff] }
  0xdc   :  { %425 = vrot.lane.b32.xlu1 %v2212_v50, %s2725_s24  ;;  %235 = vrot.lane.b32.xlu0 %v2181_v51, %s2723_s10 }
  0xde   :  { %v3318_v56 = vpop.permute.xlu1 %347  ;;  %v3320_v57 = vpop.permute.xlu0 %285 }
  0xe0   :  { %677 = vrot.lane.b32.xlu1 %v87_v6, %s2729_s20  ;;  %487 = vrot.lane.b32.xlu0 %v2227_v37, %s2726_s29  ;;  %v2228_v6 = vld [vmem:[%s4163_s1 + $0x3b1] sm:$0xff] }
  0xe2   :  { %v600_v63 = vpop.permute.xlu1 %599  ;;  %v538_v1 = vpop.permute.xlu0 %537 }
  0xe3   :  { %v810_v19 = vsel %vm805_vm7, %v793_v13, %v600_v63  ;;  %v794_v5 = vsel %vm788_vm6, %v777_v28, %v538_v1  ;;  %v2278_v1 = vld [vmem:[%s4163_s1 + $0x2c1] sm:$0xff] }
  0xe4   :  { %299 = vrot.lane.b32.xlu1 %v89_v58, %s2722_s0  ;;  %237 = vrot.lane.b32.xlu0 %v3330_v52, %s2723_s10 }
  0xe6   :  { %v3350_v48 = vpop.permute.xlu1 %411  ;;  %v3352_v10 = vpop.permute.xlu0 %349 }
  0xe8   :  { %551 = vrot.lane.b32.xlu1 %v3343_v60, %s2727_s21  ;;  %489 = vrot.lane.b32.xlu0 %v2228_v6, %s2726_s29 }
  0xea   :  { %v664_v20 = vpop.permute.xlu1 %663  ;;  %v602_v18 = vpop.permute.xlu0 %601 }
  0xeb   :  { %v827_v0 = vsel %vm822_vm8, %v810_v19, %v664_v20  ;;  %v811_v32 = vsel %vm805_vm7, %v794_v5, %v602_v18 }
  0xec   :  { %363 = vrot.lane.b32.xlu1 %v2197_v4, %s2724_s19  ;;  %301 = vrot.lane.b32.xlu0 %v3367_v14, %s2722_s0 }
  0xed   :  { %2378 = vmatprep.mubr.msk.f32.mxu0 %vm851_vm9, %v827_v0 }
  0xee   :  { %v3387_v27 = vpop.permute.xlu1 %413  ;;  %v3389_v41 = vpop.permute.xlu0 %223 }
  0xf0   :  { %615 = vrot.lane.b32.xlu1 %v3220_v9, %s2728_s12  ;;  %553 = vrot.lane.b32.xlu0 %v3383_v24, %s2727_s21 }
  0xf2   :  { %v666_v34 = vpop.permute.xlu1 %665  ;;  %v3406_v35 = vpop.permute.xlu0 %475  ;;  %s2424_s9 = spop %2423 }
  0xf3   :  { %v828_v9 = vsel %vm822_vm8, %v811_v32, %v666_v34  ;;  %s1085_s14 = smul.f32 3.0, %s2424_s9 }
  0xf4   :  { %427 = vrot.lane.b32.xlu1 %v2213_v22, %s2725_s24  ;;  %365 = vrot.lane.b32.xlu0 %v2198_v30, %s2724_s19 }
  0xf5   :  { %2379 = vmatmul.mubr.msk.f32.gmra.mxu0 %vm851_vm9, %v828_v9 }
  0xf6   :  { %v3412_v38 = vpop.permute.xlu1 %287  ;;  %v3414_v39 = vpop.permute.xlu0 %225 }
  0xf8   :  { %679 = vrot.lane.b32.xlu1 %v3257_v25, %s2729_s20  ;;  %617 = vrot.lane.b32.xlu0 %v2181_v51, %s2728_s12  ;;  %v2230_v25 = vld [vmem:[%s4163_s1 + $0x3d1] sm:$0xff]  ;;  %v710_v51 = vsel %vm703_vm1, %v2982_v45, %v3279_v29  ;;  %v2730_v45 = vmov 0.0  }
  0xf9   :  { %v727_v53 = vsel %vm720_vm2, %v710_v51, %v3300_v21  ;;  %1119 = vst.msk [vmem:[#allocation2] sm:$0xff] %vm720_vm2, %v2730_v45  ;;  %1122 = vst.msk [vmem:[#allocation2 + $0x10] sm:$0xff] %vm720_vm2, %v2730_v45 }
  0xfa   :  { %v3425_v17 = vpop.permute.xlu1 %539  ;;  %v3427_v31 = vpop.permute.xlu0 %477  ;;  %v744_v37 = vsel %vm737_vm3, %v727_v53, %v3318_v56  ;;  %1121 = vst.msk [vmem:[#allocation2 + $0x8] sm:$0x3] %vm1120_vm10, %v2730_v45  ;;  %1123 = vst.msk [vmem:[#allocation2 + $0x18] sm:$0x3] %vm1120_vm10, %v2730_v45 }
  0xfb   :  { %1124 = vst.msk [vmem:[#allocation2 + $0x20] sm:$0xff] %vm720_vm2, %v2730_v45  ;;  %1126 = vst.msk [vmem:[#allocation2 + $0x30] sm:$0xff] %vm720_vm2, %v2730_v45  ;;  %v761_v29 = vsel %vm754_vm4, %v744_v37, %v3350_v48  ;;  %v711_v48 = vsel %vm703_vm1, %v3024_v55, %v3302_v49 }
  0xfc   :  { %491 = vrot.lane.b32.xlu1 %v2229_v8, %s2726_s29  ;;  %429 = vrot.lane.b32.xlu0 %v2214_v40, %s2725_s24  ;;  %1125 = vst.msk [vmem:[#allocation2 + $0x28] sm:$0x3] %vm1120_vm10, %v2730_v45  ;;  %1127 = vst.msk [vmem:[#allocation2 + $0x38] sm:$0x3] %vm1120_vm10, %v2730_v45  ;;  %v778_v21 = vsel %vm771_vm5, %v761_v29, %v3406_v35 }
  0xfd   :  { %1128 = vst.msk [vmem:[#allocation2 + $0x40] sm:$0xff] %vm720_vm2, %v2730_v45  ;;  %1130 = vst.msk [vmem:[#allocation2 + $0x50] sm:$0xff] %vm720_vm2, %v2730_v45  ;;  %v795_v56 = vsel %vm788_vm6, %v778_v21, %v3425_v17 }
  0xfe   :  { %v3434_v42 = vpop.permute.xlu1 %351  ;;  %v3436_v43 = vpop.permute.xlu0 %289  ;;  %1129 = vst.msk [vmem:[#allocation2 + $0x48] sm:$0x3] %vm1120_vm10, %v2730_v45  ;;  %1131 = vst.msk [vmem:[#allocation2 + $0x58] sm:$0x3] %vm1120_vm10, %v2730_v45 }
  0xff   :  { %1132 = vst.msk [vmem:[#allocation2 + $0x60] sm:$0xff] %vm720_vm2, %v2730_v45  ;;  %1134 = vst.msk [vmem:[#allocation2 + $0x70] sm:$0xff] %vm720_vm2, %v2730_v45 }
 0x100   :  { %493 = vrot.lane.b32.xlu1 %v2230_v25, %s2726_s29  ;;  %681 = vrot.lane.b32.xlu0 %v89_v58, %s2729_s20  ;;  %1133 = vst.msk [vmem:[#allocation2 + $0x68] sm:$0x3] %vm1120_vm10, %v2730_v45  ;;  %1135 = vst.msk [vmem:[#allocation2 + $0x78] sm:$0x3] %vm1120_vm10, %v2730_v45 }
 0x101   :  { %1136 = vst.msk [vmem:[#allocation2 + $0x80] sm:$0xff] %vm720_vm2, %v2730_v45  ;;  %1138 = vst.msk [vmem:[#allocation2 + $0x90] sm:$0xff] %vm720_vm2, %v2730_v45 }
 0x102   :  { %v604_v47 = vpop.permute.xlu1 %603  ;;  %v3448_v50 = vpop.permute.xlu0 %541  ;;  %1137 = vst.msk [vmem:[#allocation2 + $0x88] sm:$0x3] %vm1120_vm10, %v2730_v45  ;;  %1139 = vst.msk [vmem:[#allocation2 + $0x98] sm:$0x3] %vm1120_vm10, %v2730_v45 }
 0x103   :  { %1140 = vst.msk [vmem:[#allocation2 + $0xa0] sm:$0xff] %vm720_vm2, %v2730_v45  ;;  %1142 = vst.msk [vmem:[#allocation2 + $0xb0] sm:$0xff] %vm720_vm2, %v2730_v45  ;;  %v812_v2 = vsel %vm805_vm7, %v795_v56, %v604_v47 }
 0x104   :  { %557 = vrot.lane.b32.xlu1 %v2246_v44, %s2727_s21  ;;  %555 = vrot.lane.b32.xlu0 %v3446_v46, %s2727_s21  ;;  %1141 = vst.msk [vmem:[#allocation2 + $0xa8] sm:$0x3] %vm1120_vm10, %v2730_v45  ;;  %1143 = vst.msk [vmem:[#allocation2 + $0xb8] sm:$0x3] %vm1120_vm10, %v2730_v45 }
 0x105   :  { %1144 = vst.msk [vmem:[#allocation2 + $0xc0] sm:$0xff] %vm720_vm2, %v2730_v45  ;;  %1146 = vst.msk [vmem:[#allocation2 + $0xd0] sm:$0xff] %vm720_vm2, %v2730_v45 }
 0x106   :  { %v3463_v58 = vpop.permute.xlu1 %415  ;;  %v3465_v63 = vpop.permute.xlu0 %353  ;;  %1145 = vst.msk [vmem:[#allocation2 + $0xc8] sm:$0x3] %vm1120_vm10, %v2730_v45  ;;  %1147 = vst.msk [vmem:[#allocation2 + $0xd8] sm:$0x3] %vm1120_vm10, %v2730_v45 }
 0x107   :  { %1148 = vst.msk [vmem:[#allocation2 + $0xe0] sm:$0xff] %vm720_vm2, %v2730_v45  ;;  %1150 = vst.msk [vmem:[#allocation2 + $0xf0] sm:$0xff] %vm720_vm2, %v2730_v45 }
 0x108   :  { %1149 = vst.msk [vmem:[#allocation2 + $0xe8] sm:$0x3] %vm1120_vm10, %v2730_v45  ;;  %1151 = vst.msk [vmem:[#allocation2 + $0xf8] sm:$0x3] %vm1120_vm10, %v2730_v45  ;;  %621 = vrot.lane.b32.xlu1 %v2262_v54, %s2728_s12  ;;  %619 = vrot.lane.b32.xlu0 %v3330_v52, %s2728_s12  ;;  %v728_v52 = vsel %vm720_vm2, %v711_v48, %v3320_v57 }
 0x109   :  { %1152 = vst.msk [vmem:[#allocation2 + $0x100] sm:$0xff] %vm720_vm2, %v2730_v45  ;;  %1154 = vst.msk [vmem:[#allocation2 + $0x110] sm:$0xff] %vm720_vm2, %v2730_v45  ;;  %v745_v11 = vsel %vm737_vm3, %v728_v52, %v3352_v10 }
 0x10a   :  { %1153 = vst.msk [vmem:[#allocation2 + $0x108] sm:$0x3] %vm1120_vm10, %v2730_v45  ;;  %1155 = vst.msk [vmem:[#allocation2 + $0x118] sm:$0x3] %vm1120_vm10, %v2730_v45  ;;  %v668_v3 = vpop.permute.xlu1 %667  ;;  %v606_v6 = vpop.permute.xlu0 %605  ;;  %v762_v4 = vsel %vm754_vm4, %v745_v11, %v3387_v27  ;;  %v50_v27 = vld [vmem:[%s4163_s1 + $0x240] sm:$0xff] }
 0x10b   :  { %1156 = vst.msk [vmem:[#allocation2 + $0x120] sm:$0xff] %vm720_vm2, %v2730_v45  ;;  %1158 = vst.msk [vmem:[#allocation2 + $0x130] sm:$0xff] %vm720_vm2, %v2730_v45  ;;  %v829_v33 = vsel %vm822_vm8, %v812_v2, %v668_v3  ;;  %v779_v55 = vsel %vm771_vm5, %v762_v4, %v3427_v31  ;;  %v712_v5 = vsel %vm703_vm1, %v50_v27, %v3389_v41 }
 0x10c   :  { %1157 = vst.msk [vmem:[#allocation2 + $0x128] sm:$0x3] %vm1120_vm10, %v2730_v45  ;;  %1159 = vst.msk [vmem:[#allocation2 + $0x138] sm:$0x3] %vm1120_vm10, %v2730_v45  ;;  %685 = vrot.lane.b32.xlu1 %v2278_v1, %s2729_s20  ;;  %683 = vrot.lane.b32.xlu0 %v3367_v14, %s2729_s20  ;;  %v796_v49 = vsel %vm788_vm6, %v779_v55, %v3448_v50  ;;  %v729_v22 = vsel %vm720_vm2, %v712_v5, %v3412_v38 }
 0x10d   :  { %2381 = vmatprep.mubr.msk.f32.mxu0 %vm851_vm9, %v829_v33  ;;  %v813_v14 = vsel %vm805_vm7, %v796_v49, %v606_v6  ;;  %v746_v30 = vsel %vm737_vm3, %v729_v22, %v3434_v42  ;;  %v713_v38 = vsel %vm703_vm1, %v3120_v26, %v3414_v39 }
 0x10e   :  { %v418_v59 = vpop.permute.xlu1 %417  ;;  %v228_v13 = vpop.permute.xlu0 %227  ;;  %v763_v35 = vsel %vm754_vm4, %v746_v30, %v3463_v58  ;;  %v730_v25 = vsel %vm720_vm2, %v713_v38, %v3436_v43 }
 0x10f   :  { %v747_v42 = vsel %vm737_vm3, %v730_v25, %v3465_v63  ;;  %v714_v2 = vsel %vm703_vm1, %v3158_v12, %v228_v13 }
 0x110   :  { %v764_v50 = vsel %vm754_vm4, %v747_v42, %v418_v59 }
 0x112   :  { %v670_v19 = vpop.permute.xlu1 %669  ;;  %v480_v57 = vpop.permute.xlu0 %479 }
 0x113   :  { %v830_v20 = vsel %vm822_vm8, %v813_v14, %v670_v19  ;;  %v780_v9 = vsel %vm771_vm5, %v763_v35, %v480_v57 }
 0x114   :  { %2382 = vmatmul.mubr.msk.f32.gmra.mxu0 %vm851_vm9, %v830_v20 }
 0x116   :  { %v292_v10 = vpop.permute.xlu1 %291  ;;  %v230_v18 = vpop.permute.xlu0 %229 }
 0x117   :  { %v731_v3 = vsel %vm720_vm2, %v714_v2, %v292_v10  ;;  %v715_v12 = vsel %vm703_vm1, %v3233_v15, %v230_v18 }
 0x11a   :  { %v544_v0 = vpop.permute.xlu1 %543  ;;  %v482_v7 = vpop.permute.xlu0 %481 }
 0x11b   :  { %v797_v8 = vsel %vm788_vm6, %v780_v9, %v544_v0  ;;  %v781_v51 = vsel %vm771_vm5, %v764_v50, %v482_v7 }
 0x11e   :  { %v356_v23 = vpop.permute.xlu1 %355  ;;  %v294_v16 = vpop.permute.xlu0 %293 }
 0x11f   :  { %v748_v6 = vsel %vm737_vm3, %v731_v3, %v356_v23  ;;  %v732_v13 = vsel %vm720_vm2, %v715_v12, %v294_v16 }
 0x122   :  { %v608_v61 = vpop.permute.xlu1 %607  ;;  %v546_v28 = vpop.permute.xlu0 %545 }
 0x123   :  { %v814_v40 = vsel %vm805_vm7, %v797_v8, %v608_v61  ;;  %v798_v53 = vsel %vm788_vm6, %v781_v51, %v546_v28 }
 0x126   :  { %v420_v32 = vpop.permute.xlu1 %419  ;;  %v358_v34 = vpop.permute.xlu0 %357 }
 0x127   :  { %v765_v52 = vsel %vm754_vm4, %v748_v6, %v420_v32  ;;  %v749_v19 = vsel %vm737_vm3, %v732_v13, %v358_v34 }
 0x12a   :  { %v672_v17 = vpop.permute.xlu1 %671  ;;  %v610_v31 = vpop.permute.xlu0 %609 }
 0x12b   :  { %v831_v41 = vsel %vm822_vm8, %v814_v40, %v672_v17  ;;  %v815_v54 = vsel %vm805_vm7, %v798_v53, %v610_v31 }
 0x12c   :  { %2384 = vmatprep.mubr.msk.f32.mxu0 %vm851_vm9, %v831_v41 }
 0x12e   :  { %v422_v44 = vpop.permute.xlu1 %421  ;;  %v232_v47 = vpop.permute.xlu0 %231 }
 0x12f   :  { %v766_v10 = vsel %vm754_vm4, %v749_v19, %v422_v44  ;;  %v716_v35 = vsel %vm703_vm1, %v3273_v36, %v232_v47 }
 0x132   :  { %v674_v37 = vpop.permute.xlu1 %673  ;;  %v484_v26 = vpop.permute.xlu0 %483 }
 0x133   :  { %v832_v39 = vsel %vm822_vm8, %v815_v54, %v674_v37  ;;  %v782_v11 = vsel %vm771_vm5, %v765_v52, %v484_v26 }
 0x134   :  { %2385 = vmatmul.mubr.msk.f32.gmra.mxu0 %vm851_vm9, %v832_v39 }
 0x136   :  { %v296_v43 = vpop.permute.xlu1 %295  ;;  %v234_v58 = vpop.permute.xlu0 %233 }
 0x137   :  { %v733_v9 = vsel %vm720_vm2, %v716_v35, %v296_v43  ;;  %v717_v36 = vsel %vm703_vm1, %v3343_v60, %v234_v58  ;;  %v3612_v58 = vld [vmem:[%s4165_s3] ss:$0 sm:$0xff]  ;;  %s2731_s3 = smov 40  }
 0x13a   :  { %v548_v45 = vpop.permute.xlu1 %547  ;;  %v486_v63 = vpop.permute.xlu0 %485 }
 0x13b   :  { %v799_v59 = vsel %vm788_vm6, %v782_v11, %v548_v45  ;;  %v783_v0 = vsel %vm771_vm5, %v766_v10, %v486_v63 }
 0x13e   :  { %v360_v29 = vpop.permute.xlu1 %359  ;;  %v298_v21 = vpop.permute.xlu0 %297 }
 0x13f   :  { %v750_v8 = vsel %vm737_vm3, %v733_v9, %v360_v29  ;;  %v734_v47 = vsel %vm720_vm2, %v717_v36, %v298_v21  ;;  %v1225_v36 = vld [vmem:[#allocation2 + $0x2] sm:$0xff] }
 0x142   :  { %v612_v56 = vpop.permute.xlu1 %611  ;;  %v550_v1 = vpop.permute.xlu0 %549 }
 0x143   :  { %v816_v4 = vsel %vm805_vm7, %v799_v59, %v612_v56  ;;  %v800_v7 = vsel %vm788_vm6, %v783_v0, %v550_v1  ;;  %v3623_v59 = vstv %s1085_s14 }
 0x146   :  { %v424_v33 = vpop.permute.xlu1 %423  ;;  %v362_v48 = vpop.permute.xlu0 %361 }
 0x147   :  { %v767_v31 = vsel %vm754_vm4, %v750_v8, %v424_v33  ;;  %v751_v51 = vsel %vm737_vm3, %v734_v47, %v362_v48 }
 0x14a   :  { %v676_v55 = vpop.permute.xlu1 %675  ;;  %v614_v49 = vpop.permute.xlu0 %613 }
 0x14b   :  { %v833_v14 = vsel %vm822_vm8, %v816_v4, %v676_v55  ;;  %v817_v23 = vsel %vm805_vm7, %v800_v7, %v614_v49 }
 0x14c   :  { %2387 = vmatprep.mubr.msk.f32.mxu0 %vm851_vm9, %v833_v14 }
 0x14e   :  { %v426_v57 = vpop.permute.xlu1 %425  ;;  %v236_v20 = vpop.permute.xlu0 %235 }
 0x14f   :  { %v768_v37 = vsel %vm754_vm4, %v751_v51, %v426_v57  ;;  %v718_v3 = vsel %vm703_vm1, %v3383_v24, %v236_v20 }
 0x152   :  { %v678_v27 = vpop.permute.xlu1 %677  ;;  %v488_v61 = vpop.permute.xlu0 %487 }
 0x153   :  { %v834_v15 = vsel %vm822_vm8, %v817_v23, %v678_v27  ;;  %v784_v41 = vsel %vm771_vm5, %v767_v31, %v488_v61 }
 0x154   :  { %2388 = vmatmul.mubr.msk.f32.gmra.mxu0 %vm851_vm9, %v834_v15 }
 0x156   :  { %v300_v18 = vpop.permute.xlu1 %299  ;;  %v238_v16 = vpop.permute.xlu0 %237 }
 0x157   :  { %v719_v6 = vsel %vm703_vm1, %v3446_v46, %v238_v16  ;;  %v735_v52 = vsel %vm720_vm2, %v718_v3, %v300_v18 }
 0x15a   :  { %v552_v28 = vpop.permute.xlu1 %551  ;;  %v490_v5 = vpop.permute.xlu0 %489 }
 0x15b   :  { %v801_v38 = vsel %vm788_vm6, %v784_v41, %v552_v28  ;;  %v785_v26 = vsel %vm771_vm5, %v768_v37, %v490_v5 }
 0x15e   :  { %v364_v22 = vpop.permute.xlu1 %363  ;;  %v302_v30 = vpop.permute.xlu0 %301 }
 0x15f   :  { %v736_v11 = vsel %vm720_vm2, %v719_v6, %v302_v30  ;;  %v752_v4 = vsel %vm737_vm3, %v735_v52, %v364_v22 }
 0x162   :  { %v616_v32 = vpop.permute.xlu1 %615  ;;  %v554_v34 = vpop.permute.xlu0 %553 }
 0x163   :  { %v818_v25 = vsel %vm805_vm7, %v801_v38, %v616_v32  ;;  %v802_v39 = vsel %vm788_vm6, %v785_v26, %v554_v34 }
 0x166   :  { %v428_v40 = vpop.permute.xlu1 %427  ;;  %v366_v17 = vpop.permute.xlu0 %365 }
 0x167   :  { %v753_v55 = vsel %vm737_vm3, %v736_v11, %v366_v17  ;;  %v769_v46 = vsel %vm754_vm4, %v752_v4, %v428_v40 }
 0x16a   :  { %v680_v42 = vpop.permute.xlu1 %679  ;;  %v618_v44 = vpop.permute.xlu0 %617 }
 0x16b   :  { %v835_v50 = vsel %vm822_vm8, %v818_v25, %v680_v42  ;;  %v819_v43 = vsel %vm805_vm7, %v802_v39, %v618_v44  ;;  %v1201_v42 = vld [vmem:[#allocation2 + $0x1] sm:$0xff] }
 0x16c   :  { %2390 = vmatprep.mubr.msk.f32.mxu0 %vm851_vm9, %v835_v50 }
 0x16e   :  { %v492_v53 = vpop.permute.xlu1 %491  ;;  %v430_v54 = vpop.permute.xlu0 %429 }
 0x16f   :  { %v770_v13 = vsel %vm754_vm4, %v753_v55, %v430_v54  ;;  %v786_v19 = vsel %vm771_vm5, %v769_v46, %v492_v53 }
 0x172   :  { %v494_v45 = vpop.permute.xlu1 %493  ;;  %v682_v63 = vpop.permute.xlu0 %681 }
 0x173   :  { %v836_v60 = vsel %vm822_vm8, %v819_v43, %v682_v63  ;;  %v787_v57 = vsel %vm771_vm5, %v770_v13, %v494_v45 }
 0x174   :  { %2391 = vmatmul.mubr.msk.f32.gmra.mxu0 %vm851_vm9, %v836_v60 }
 0x175   :  { %v2374_v29 = vpop.f32.mrf.mxu0 }
 0x176   :  { %v976_v21 = vadd.f32 %v2374_v29, %v3612_v58  ;;  %v558_v56 = vpop.permute.xlu1 %557  ;;  %v556_v1 = vpop.permute.xlu0 %555 }
 0x177   :  { %v970_v2 = vpop.f32.mrf.mxu0  ;;  %v804_v0 = vsel %vm788_vm6, %v787_v57, %v558_v56  ;;  %v803_v7 = vsel %vm788_vm6, %v786_v19, %v556_v1 }
 0x178   :  { %v1050_v33 = vmax.f32 %v976_v21, 0.0  ;;  %v971_v48 = vadd.f32 %v3612_v58, %v970_v2 }
 0x17a   :  { %v1067_v49 = vmin.f32 %v3193_v62, %v1050_v33  ;;  %v1049_v14 = vmax.f32 %v971_v48, 0.0  ;;  %v622_v24 = vpop.permute.xlu1 %621  ;;  %v620_v12 = vpop.permute.xlu0 %619 }
 0x17b   :  { %v821_v23 = vsel %vm805_vm7, %v804_v0, %v622_v24  ;;  %v820_v27 = vsel %vm805_vm7, %v803_v7, %v620_v12 }
 0x17c   :  { %v1066_v20 = vmin.f32 %v3193_v62, %v1049_v14  ;;  %v1088_v10 = vmul.f32 %v3623_v59, %v1067_v49 }
 0x17e   :  { %v686_v61 = vpop.permute.xlu1 %685  ;;  %v684_v15 = vpop.permute.xlu0 %683  ;;  %v1087_v18 = vmul.f32 %v3623_v59, %v1066_v20  ;;  %v2435_v16 = vcvt.f32.s32 %v1088_v10  ;;  %v2433_v34 = vand.u32 2147483647, %v1088_v10  ;;  %v2438_v8 = vand.u32 2147483648, %v1088_v10 }
 0x17f   :  { %v838_v28 = vsel %vm822_vm8, %v821_v23, %v686_v61  ;;  %v837_v5 = vsel %vm822_vm8, %v820_v27, %v684_v15 }
 0x180   :  { %2393 = vmatprep.mubr.msk.f32.mxu0 %vm851_vm9, %v837_v5  ;;  %v2427_v22 = vcvt.f32.s32 %v1087_v18  ;;  %v2436_v30 = vcvt.s32.f32 %v2435_v16  ;;  %v2425_v35 = vand.u32 2147483647, %v1087_v18  ;;  %v2430_v17 = vand.u32 2147483648, %v1087_v18 }
 0x181   :  { %2394 = vmatmul.mubr.msk.f32.gmra.mxu0 %vm851_vm9, %v838_v28  ;;  %vm2434_vm11 = vcmp.lt.f32.partialorder %v2433_v34, 8388608.0  ;;  %v2698_v28 = vld [vmem:[%s4166_s4 + $0x20] ss:$0 sps:$4 sm:$0xff]  }
 0x182   :  { %v2428_v32 = vcvt.s32.f32 %v2427_v22  ;;  %v2437_v9 = vand.u32 2147483647, %v2436_v30  ;;  %vm2426_vm12 = vcmp.lt.f32.partialorder %v2425_v35, 8388608.0  ;;  %2422 = vmatprep.subr.msk.bf16.mxu1 %vm900_vm0, %v2698_v28  ;;  %v1780_v34 = vsel %vm900_vm0, %v2698_v28, 0 }
 0x183   :  { %2397 = vmatpush3.bf16.msra.mxu1 %v1780_v34 }
 0x184   :  { %v2429_v40 = vand.u32 2147483647, %v2428_v32  ;;  %v2439_v31 = vor.u32 %v2438_v8, %v2437_v9  ;;  %v2699_v8 = vld [vmem:[%s4166_s4 + $0x18] sm:$0xff]  }
 0x185   :  { %2398 = vmatprep.subr.bf16.mxu1 %v2699_v8 }
 0x186   :  { %v2431_v41 = vor.u32 %v2430_v17, %v2429_v40  ;;  %v2440_v38 = vsel %vm2434_vm11, %v2439_v31, %v1088_v10  ;;  %vm1658_vm11 = vcmask 326656  }
 0x187   :  { %1162 = vst.msk [vmem:[#allocation2 + $0x21] sm:$0xff] %vm720_vm2, %v2440_v38  ;;  %2399 = vmatpush3.bf16.msra.mxu1 %v2699_v8 }
 0x188   :  { %v2432_v25 = vsel %vm2426_vm12, %v2431_v41, %v1087_v18  ;;  %vm1675_vm12 = vcmask 392192  }
 0x189   :  { %1161 = vst.msk [vmem:[#allocation2 + $0x11] sm:$0xff] %vm720_vm2, %v2432_v25 }
 0x18e   :  { %v1250_v45 = vld [vmem:[#allocation2 + $0x20] sm:$0xff] }
 0x18f   :  { %v1274_v1 = vld [vmem:[#allocation2 + $0x21] sm:$0xff] }
 0x190   :  { %v1202_v44 = vld [vmem:[#allocation2 + $0x11] sm:$0xff]  ;;  %v1298_v52 = vld [vmem:[#allocation2 + $0x22] sm:$0xff] }
 0x191   :  { %v1217_v50 = vpack.c.bf16 %v1202_v44, %v1201_v42  ;;  %v1226_v47 = vld [vmem:[#allocation2 + $0x12] sm:$0xff]  ;;  %v1289_v2 = vpack.c.bf16 %v1274_v1, %v1202_v44 }
 0x192   :  { %v1241_v53 = vpack.c.bf16 %v1226_v47, %v1225_v36  ;;  %v3647_v37 = vld [vmem:[#allocation2 + $0x10] sm:$0xff]  ;;  %v1313_v4 = vpack.c.bf16 %v1298_v52, %v1226_v47 }
 0x193   :  { %1402 = vrot.lane.b32.xlu0 %v1217_v50, %s2722_s0  ;;  %v1265_v63 = vpack.c.bf16 %v1250_v45, %v3647_v37  ;;  %v2700_v42 = vld [vmem:[%s4166_s4 + $0x10] sm:$0xff]  }
 0x194   :  { %2400 = vmatprep.subr.bf16.mxu1 %v2700_v42 }
 0x195   :  { %v2377_v51 = vpop.f32.mrf.mxu0  ;;  %2401 = vmatpush3.bf16.msra.mxu1 %v2700_v42 }
 0x196   :  { %v986_v54 = vadd.f32 %v2377_v51, %v3612_v58 }
 0x197   :  { %v980_v26 = vpop.f32.mrf.mxu0  ;;  %1426 = vrot.lane.b32.xlu0 %v1241_v53, %s2725_s24 }
 0x198   :  { %v1052_v39 = vmax.f32 %v986_v54, 0.0  ;;  %v981_v43 = vadd.f32 %v3612_v58, %v980_v26 }
 0x19a   :  { %v1069_v60 = vmin.f32 %v3193_v62, %v1052_v39  ;;  %v1051_v29 = vmax.f32 %v981_v43, 0.0  ;;  %v2701_v43 = vld [vmem:[%s4166_s4 + $0x8] sm:$0xff]  }
 0x19b   :  { %1450 = vrot.lane.b32.xlu0 %v1265_v63, %s2727_s21  ;;  %2402 = vmatprep.subr.bf16.mxu1 %v2701_v43 }
 0x19c   :  { %v1090_v21 = vmul.f32 %v3623_v59, %v1069_v60  ;;  %v1068_v56 = vmin.f32 %v3193_v62, %v1051_v29  ;;  %2403 = vmatpush3.bf16.msra.mxu1 %v2701_v43 }
 0x19e   :  { %v2451_v3 = vcvt.f32.s32 %v1090_v21  ;;  %v1089_v6 = vmul.f32 %v3623_v59, %v1068_v56  ;;  %v2449_v11 = vand.u32 2147483647, %v1090_v21  ;;  %v2454_v49 = vand.u32 2147483648, %v1090_v21  ;;  %v2702_v56 = vld [vmem:[%s4166_s4] sm:$0xff]   ;;  %s3812_s4 = sld [smem:[#allocation3 + $0x1]] }
 0x19f   :  { %1474 = vrot.lane.b32.xlu0 %v1289_v2, %s2729_s20  ;;  %2404 = vmatprep.subr.bf16.mxu1 %v2702_v56 }
 0x1a0   :  { %v2452_v33 = vcvt.s32.f32 %v2451_v3  ;;  %v2443_v48 = vcvt.f32.s32 %v1089_v6  ;;  %v2441_v24 = vand.u32 2147483647, %v1089_v6  ;;  %v2446_v13 = vand.u32 2147483648, %v1089_v6  ;;  %2405 = vmatpush3.bf16.msra.mxu1 %v2702_v56 }
 0x1a1   :  { %vm2450_vm13 = vcmp.lt.f32.partialorder %v2449_v11, 8388608.0 }
 0x1a2   :  { %v2453_v55 = vand.u32 2147483647, %v2452_v33  ;;  %v2444_v14 = vcvt.s32.f32 %v2443_v48  ;;  %vm2442_vm14 = vcmp.lt.f32.partialorder %v2441_v24, 8388608.0 }
 0x1a3   :  { %1498 = vrot.lane.b32.xlu0 %v1313_v4, %s2731_s3 }
 0x1a4   :  { %v2455_v12 = vor.u32 %v2454_v49, %v2453_v55  ;;  %v2445_v46 = vand.u32 2147483647, %v2444_v14 }
 0x1a6   :  { %v2456_v19 = vsel %vm2450_vm13, %v2455_v12, %v1090_v21  ;;  %v2447_v57 = vor.u32 %v2446_v13, %v2445_v46  ;;  %vm1692_vm13 = vcmask 457728  }
 0x1a7   :  { %1164 = vst.msk [vmem:[#allocation2 + $0x41] sm:$0xff] %vm720_vm2, %v2456_v19 }
 0x1a8   :  { %v2448_v20 = vsel %vm2442_vm14, %v2447_v57, %v1089_v6  ;;  %vm1709_vm14 = vcmask 523264  }
 0x1a9   :  { %1163 = vst.msk [vmem:[#allocation2 + $0x31] sm:$0xff] %vm720_vm2, %v2448_v20 }
 0x1ae   :  { %v1252_v30 = vld [vmem:[#allocation2 + $0x40] sm:$0xff] }
 0x1af   :  { %v1276_v31 = vld [vmem:[#allocation2 + $0x41] sm:$0xff] }
 0x1b0   :  { %v1204_v10 = vld [vmem:[#allocation2 + $0x31] sm:$0xff]  ;;  %v1300_v36 = vld [vmem:[#allocation2 + $0x42] sm:$0xff] }
 0x1b1   :  { %v1323_v0 = vld [vmem:[#allocation2 + $0x30] sm:$0xff]  ;;  %v1218_v7 = vpack.c.bf16 %v1204_v10, %v1274_v1  ;;  %v1290_v41 = vpack.c.bf16 %v1276_v31, %v1204_v10 }
 0x1b2   :  { %v3661_v23 = vpack.c.bf16 %v1323_v0, %v1250_v45  ;;  %v1228_v27 = vld [vmem:[#allocation2 + $0x32] sm:$0xff]  ;;  %v1266_v32 = vpack.c.bf16 %v1252_v30, %v1323_v0 }
 0x1b3   :  { %1404 = vrot.lane.b32.xlu1 %v1218_v7, %s2722_s0  ;;  %v1242_v15 = vpack.c.bf16 %v1228_v27, %v1298_v52  ;;  %v1314_v51 = vpack.c.bf16 %v1300_v36, %v1228_v27 }
 0x1b4   :  { %1522 = vrot.lane.b32.xlu0 %v3661_v23, %s2732_s15 }
 0x1b5   :  { %v2380_v61 = vpop.f32.mrf.mxu0 }
 0x1b6   :  { %v996_v18 = vadd.f32 %v2380_v61, %v3612_v58 }
 0x1b7   :  { %v990_v16 = vpop.f32.mrf.mxu0  ;;  %1428 = vrot.lane.b32.xlu1 %v1242_v15, %s2725_s24 }
 0x1b8   :  { %1546 = vrot.lane.b32.xlu0 %v1218_v7, %s2733_s16  ;;  %v1054_v5 = vmax.f32 %v996_v18, 0.0  ;;  %v991_v22 = vadd.f32 %v3612_v58, %v990_v16 }
 0x1ba   :  { %v1071_v35 = vmin.f32 %v3193_v62, %v1054_v5  ;;  %v1053_v9 = vmax.f32 %v991_v22, 0.0 }
 0x1bb   :  { %1452 = vrot.lane.b32.xlu1 %v1266_v32, %s2727_s21 }
 0x1bc   :  { %1570 = vrot.lane.b32.xlu0 %v1242_v15, %s2734_s22  ;;  %v1092_v40 = vmul.f32 %v3623_v59, %v1071_v35  ;;  %v1070_v17 = vmin.f32 %v3193_v62, %v1053_v9 }
 0x1be   :  { %v2467_v38 = vcvt.f32.s32 %v1092_v40  ;;  %v1091_v25 = vmul.f32 %v3623_v59, %v1070_v17  ;;  %v2465_v47 = vand.u32 2147483647, %v1092_v40  ;;  %v2470_v54 = vand.u32 2147483648, %v1092_v40  ;;  %v1329_v17 = vld [vmem:[#allocation2 + $0x90] sm:$0xff] }
 0x1bf   :  { %1476 = vrot.lane.b32.xlu1 %v1290_v41, %s2729_s20 }
 0x1c0   :  { %v2468_v44 = vcvt.s32.f32 %v2467_v38  ;;  %v2459_v50 = vcvt.f32.s32 %v1091_v25  ;;  %v2457_v39 = vand.u32 2147483647, %v1091_v25  ;;  %v2462_v60 = vand.u32 2147483648, %v1091_v25 }
 0x1c1   :  { %vm2466_vm15 = vcmp.lt.f32.partialorder %v2465_v47, 8388608.0 }
 0x1c2   :  { %v2469_v53 = vand.u32 2147483647, %v2468_v44  ;;  %v2460_v26 = vcvt.s32.f32 %v2459_v50  ;;  %vm2458_vm0 = vcmp.lt.f32.partialorder %v2457_v39, 8388608.0  ;;  %v1353_v50 = vld [vmem:[#allocation2 + $0x91] sm:$0xff] }
 0x1c3   :  { %1500 = vrot.lane.b32.xlu1 %v1314_v51, %s2731_s3 }
 0x1c4   :  { %v2471_v45 = vor.u32 %v2470_v54, %v2469_v53  ;;  %v2461_v63 = vand.u32 2147483647, %v2460_v26 }
 0x1c6   :  { %v2472_v29 = vsel %vm2466_vm15, %v2471_v45, %v1092_v40  ;;  %v2463_v21 = vor.u32 %v2462_v60, %v2461_v63  ;;  %vm1762_vm15 = vcmask 588800  }
 0x1c7   :  { %1166 = vst.msk [vmem:[#allocation2 + $0x61] sm:$0xff] %vm720_vm2, %v2472_v29 }
 0x1c8   :  { %v2464_v1 = vsel %vm2458_vm0, %v2463_v21, %v1091_v25 }
 0x1c9   :  { %1165 = vst.msk [vmem:[#allocation2 + $0x51] sm:$0xff] %vm720_vm2, %v2464_v1 }
 0x1ce   :  { %v1254_v24 = vld [vmem:[#allocation2 + $0x60] sm:$0xff] }
 0x1cf   :  { %v1278_v20 = vld [vmem:[#allocation2 + $0x61] sm:$0xff] }
 0x1d0   :  { %v1325_v2 = vld [vmem:[#allocation2 + $0x50] sm:$0xff]  ;;  %v1302_v18 = vld [vmem:[#allocation2 + $0x62] sm:$0xff] }
 0x1d1   :  { %v1373_v3 = vld [vmem:[#allocation2 + $0x52] sm:$0xff]  ;;  %v3697_v6 = vpack.c.bf16 %v1325_v2, %v1252_v30  ;;  %v1267_v13 = vpack.c.bf16 %v1254_v24, %v1325_v2 }
 0x1d2   :  { %v1387_v33 = vpack.c.bf16 %v1373_v3, %v1300_v36  ;;  %v1349_v48 = vld [vmem:[#allocation2 + $0x51] sm:$0xff]  ;;  %v1315_v22 = vpack.c.bf16 %v1302_v18, %v1373_v3 }
 0x1d3   :  { %1524 = vrot.lane.b32.xlu1 %v3697_v6, %s2732_s15  ;;  %v1363_v4 = vpack.c.bf16 %v1349_v48, %v1276_v31  ;;  %v1291_v7 = vpack.c.bf16 %v1278_v20, %v1349_v48  ;;  %v1377_v31 = vld [vmem:[#allocation2 + $0x92] sm:$0xff] }
 0x1d4   :  { %1572 = vrot.lane.b32.xlu0 %v1387_v33, %s2734_s22  ;;  %v2383_v52 = vpop.f32.mrf.mxu0 }
 0x1d5   :  { %v1006_v11 = vadd.f32 %v2383_v52, %v3612_v58 }
 0x1d6   :  { %v1000_v55 = vpop.f32.mrf.mxu0 }
 0x1d7   :  { %v1056_v49 = vmax.f32 %v1006_v11, 0.0  ;;  %v1001_v14 = vadd.f32 %v3612_v58, %v1000_v55  ;;  %1548 = vrot.lane.b32.xlu1 %v1363_v4, %s2733_s16 }
 0x1d8   :  { %1430 = vrot.lane.b32.xlu0 %v1387_v33, %s2725_s24 }
 0x1d9   :  { %v1073_v12 = vmin.f32 %v3193_v62, %v1056_v49  ;;  %v1055_v46 = vmax.f32 %v1001_v14, 0.0 }
 0x1db   :  { %v1094_v19 = vmul.f32 %v3623_v59, %v1073_v12  ;;  %v1072_v57 = vmin.f32 %v3193_v62, %v1055_v46  ;;  %1406 = vrot.lane.b32.xlu1 %v1363_v4, %s2722_s0 }
 0x1dc   :  { %1454 = vrot.lane.b32.xlu0 %v1267_v13, %s2727_s21 }
 0x1dd   :  { %v2483_v10 = vcvt.f32.s32 %v1094_v19  ;;  %v1093_v0 = vmul.f32 %v3623_v59, %v1072_v57  ;;  %v2481_v15 = vand.u32 2147483647, %v1094_v19  ;;  %v2486_v28 = vand.u32 2147483648, %v1094_v19 }
 0x1df   :  { %v2484_v27 = vcvt.s32.f32 %v2483_v10  ;;  %v2475_v61 = vcvt.f32.s32 %v1093_v0  ;;  %v2473_v30 = vand.u32 2147483647, %v1093_v0  ;;  %v2478_v35 = vand.u32 2147483648, %v1093_v0 }
 0x1e0   :  { %1478 = vrot.lane.b32.xlu0 %v1291_v7, %s2729_s20  ;;  %vm2482_vm1 = vcmp.lt.f32.partialorder %v2481_v15, 8388608.0 }
 0x1e1   :  { %v2485_v16 = vand.u32 2147483647, %v2484_v27  ;;  %v2476_v5 = vcvt.s32.f32 %v2475_v61  ;;  %vm2474_vm3 = vcmp.lt.f32.partialorder %v2473_v30, 8388608.0  ;;  %v1209_v27 = vld [vmem:[#allocation2 + $0xa1] sm:$0xff] }
 0x1e2   :  { %v1233_v61 = vld [vmem:[#allocation2 + $0xa2] sm:$0xff] }
 0x1e3   :  { %v2487_v32 = vor.u32 %v2486_v28, %v2485_v16  ;;  %v2477_v34 = vand.u32 2147483647, %v2476_v5 }
 0x1e4   :  { %1502 = vrot.lane.b32.xlu0 %v1315_v22, %s2731_s3 }
 0x1e5   :  { %v2488_v9 = vsel %vm2482_vm1, %v2487_v32, %v1094_v19  ;;  %v2479_v8 = vor.u32 %v2478_v35, %v2477_v34 }
 0x1e6   :  { %1168 = vst.msk [vmem:[#allocation2 + $0x81] sm:$0xff] %vm720_vm2, %v2488_v9 }
 0x1e7   :  { %v2480_v40 = vsel %vm2474_vm3, %v2479_v8, %v1093_v0 }
 0x1e8   :  { %1167 = vst.msk [vmem:[#allocation2 + $0x71] sm:$0xff] %vm720_vm2, %v2480_v40 }
 0x1ed   :  { %v1328_v41 = vld [vmem:[#allocation2 + $0x80] sm:$0xff] }
 0x1ee   :  { %v1376_v38 = vld [vmem:[#allocation2 + $0x82] sm:$0xff]  ;;  %v1341_v25 = vpack.c.bf16 %v1329_v17, %v1328_v41 }
 0x1ef   :  { %v1389_v42 = vpack.c.bf16 %v1377_v31, %v1376_v38  ;;  %v1352_v44 = vld [vmem:[#allocation2 + $0x81] sm:$0xff]  ;;  %v1327_v36 = vld [vmem:[#allocation2 + $0x70] sm:$0xff] }
 0x1f0   :  { %1528 = vrot.lane.b32.xlu1 %v1341_v25, %s2732_s15  ;;  %v1365_v47 = vpack.c.bf16 %v1353_v50, %v1352_v44  ;;  %v3718_v51 = vpack.c.bf16 %v1327_v36, %v1254_v24  ;;  %v1208_v53 = vld [vmem:[#allocation2 + $0x71] sm:$0xff]  ;;  %v1268_v48 = vpack.c.bf16 %v1328_v41, %v1327_v36 }
 0x1f1   :  { %1576 = vrot.lane.b32.xlu0 %v1389_v42, %s2734_s22  ;;  %v1220_v43 = vpack.c.bf16 %v1208_v53, %v1278_v20  ;;  %v1232_v60 = vld [vmem:[#allocation2 + $0x72] sm:$0xff]  ;;  %v1292_v12 = vpack.c.bf16 %v1352_v44, %v1208_v53 }
 0x1f2   :  { %v1244_v56 = vpack.c.bf16 %v1232_v60, %v1302_v18  ;;  %v1316_v10 = vpack.c.bf16 %v1376_v38, %v1232_v60 }
 0x1f4   :  { %v2386_v54 = vpop.f32.mrf.mxu0  ;;  %1552 = vrot.lane.b32.xlu1 %v1365_v47, %s2733_s16 }
 0x1f5   :  { %1526 = vrot.lane.b32.xlu0 %v3718_v51, %s2732_s15  ;;  %v1016_v26 = vadd.f32 %v2386_v54, %v3612_v58 }
 0x1f6   :  { %v1010_v39 = vpop.f32.mrf.mxu0 }
 0x1f7   :  { %v1058_v45 = vmax.f32 %v1016_v26, 0.0  ;;  %v1011_v63 = vadd.f32 %v3612_v58, %v1010_v39 }
 0x1f8   :  { %1408 = vrot.lane.b32.xlu1 %v1220_v43, %s2722_s0 }
 0x1f9   :  { %1550 = vrot.lane.b32.xlu0 %v1220_v43, %s2733_s16  ;;  %v1075_v29 = vmin.f32 %v3193_v62, %v1058_v45  ;;  %v1057_v21 = vmax.f32 %v1011_v63, 0.0 }
 0x1fb   :  { %v1096_v1 = vmul.f32 %v3623_v59, %v1075_v29  ;;  %v1074_v2 = vmin.f32 %v3193_v62, %v1057_v21  ;;  %v1177_v21 = vld [vmem:[#allocation2] sm:$0xff] }
 0x1fc   :  { %1432 = vrot.lane.b32.xlu1 %v1244_v56, %s2725_s24 }
 0x1fd   :  { %1574 = vrot.lane.b32.xlu0 %v1244_v56, %s2734_s22  ;;  %v2499_v3 = vcvt.f32.s32 %v1096_v1  ;;  %v1095_v33 = vmul.f32 %v3623_v59, %v1074_v2  ;;  %v2497_v4 = vand.u32 2147483647, %v1096_v1  ;;  %v2502_v49 = vand.u32 2147483648, %v1096_v1 }
 0x1ff   :  { %v2500_v52 = vcvt.s32.f32 %v2499_v3  ;;  %v2491_v11 = vcvt.f32.s32 %v1095_v33  ;;  %v2489_v24 = vand.u32 2147483647, %v1095_v33  ;;  %v2494_v19 = vand.u32 2147483648, %v1095_v33 }
 0x200   :  { %1456 = vrot.lane.b32.xlu1 %v1268_v48, %s2727_s21  ;;  %vm2498_vm5 = vcmp.lt.f32.partialorder %v2497_v4, 8388608.0 }
 0x201   :  { %v2501_v55 = vand.u32 2147483647, %v2500_v52  ;;  %v2492_v14 = vcvt.s32.f32 %v2491_v11  ;;  %vm2490_vm7 = vcmp.lt.f32.partialorder %v2489_v24, 8388608.0 }
 0x203   :  { %v2503_v46 = vor.u32 %v2502_v49, %v2501_v55  ;;  %v2493_v13 = vand.u32 2147483647, %v2492_v14 }
 0x204   :  { %1480 = vrot.lane.b32.xlu1 %v1292_v12, %s2729_s20 }
 0x205   :  { %v2504_v57 = vsel %vm2498_vm5, %v2503_v46, %v1096_v1  ;;  %v2495_v20 = vor.u32 %v2494_v19, %v2493_v13  ;;  %v1403_v7 = vpop.permute.xlu0 %1402 }
 0x206   :  { %1170 = vst.msk [vmem:[#allocation2 + $0xc1] sm:$0xff] %vm720_vm2, %v2504_v57 }
 0x207   :  { %v2496_v0 = vsel %vm2490_vm7, %v2495_v20, %v1095_v33  ;;  %v1193_v33 = vpack.c.bf16 %v3647_v37, %v1177_v21  ;;  %vm2005_vm7 = vcmask 15360  }
 0x208   :  { %1169 = vst.msk [vmem:[#allocation2 + $0xb1] sm:$0xff] %vm720_vm2, %v2496_v0  ;;  %1504 = vrot.lane.b32.xlu1 %v1316_v10, %s2731_s3 }
 0x209   :  { %v1427_v15 = vpop.permute.xlu0 %1426  ;;  %v1588_v4 = vsel %vm720_vm2, %v1193_v33, %v1403_v7 }
 0x20a   :  { %v1611_v49 = vsel %vm754_vm4, %v1588_v4, %v1427_v15 }
 0x20d   :  { %v3742_v30 = vld [vmem:[#allocation2 + $0xc0] sm:$0xff]  ;;  %v1451_v35 = vpop.permute.xlu0 %1450 }
 0x20e   :  { %v1282_v31 = vld [vmem:[#allocation2 + $0xc1] sm:$0xff]  ;;  %v1627_v14 = vsel %vm788_vm6, %v1611_v49, %v1451_v35 }
 0x20f   :  { %v1210_v18 = vld [vmem:[#allocation2 + $0xb1] sm:$0xff]  ;;  %v1306_v36 = vld [vmem:[#allocation2 + $0xc2] sm:$0xff] }
 0x210   :  { %v1234_v16 = vld [vmem:[#allocation2 + $0xb2] sm:$0xff]  ;;  %v1221_v28 = vpack.c.bf16 %v1210_v18, %v1209_v27  ;;  %v1293_v41 = vpack.c.bf16 %v1282_v31, %v1210_v18 }
 0x211   :  { %v1245_v5 = vpack.c.bf16 %v1234_v16, %v1233_v61  ;;  %v3738_v22 = vld [vmem:[#allocation2 + $0xb0] sm:$0xff]  ;;  %v1475_v42 = vpop.permute.xlu0 %1474  ;;  %v1317_v47 = vpack.c.bf16 %v1306_v36, %v1234_v16 }
 0x212   :  { %1410 = vrot.lane.b32.xlu1 %v1221_v28, %s2722_s0  ;;  %v1269_v34 = vpack.c.bf16 %v3742_v30, %v3738_v22  ;;  %v1643_v12 = vsel %vm822_vm8, %v1627_v14, %v1475_v42 }
 0x213   :  { %1434 = vrot.lane.b32.xlu0 %v1245_v5, %s2725_s24 }
 0x214   :  { %v2389_v32 = vpop.f32.mrf.mxu0 }
 0x215   :  { %v1026_v9 = vadd.f32 %v2389_v32, %v3612_v58  ;;  %v1499_v60 = vpop.permute.xlu0 %1498 }
 0x216   :  { %v1020_v8 = vpop.f32.mrf.mxu0  ;;  %v1660_v46 = vsel %vm1658_vm11, %v1643_v12, %v1499_v60 }
 0x217   :  { %1458 = vrot.lane.b32.xlu0 %v1269_v34, %s2727_s21  ;;  %v1060_v40 = vmax.f32 %v1026_v9, 0.0  ;;  %v1021_v17 = vadd.f32 %v3612_v58, %v1020_v8 }
 0x219   :  { %v1077_v38 = vmin.f32 %v3193_v62, %v1060_v40  ;;  %v1059_v25 = vmax.f32 %v1021_v17, 0.0 }
 0x21b   :  { %1482 = vrot.lane.b32.xlu0 %v1293_v41, %s2729_s20  ;;  %v1098_v44 = vmul.f32 %v3623_v59, %v1077_v38  ;;  %v1076_v50 = vmin.f32 %v3193_v62, %v1059_v25 }
 0x21d   :  { %v2515_v53 = vcvt.f32.s32 %v1098_v44  ;;  %v1097_v54 = vmul.f32 %v3623_v59, %v1076_v50  ;;  %v2513_v43 = vand.u32 2147483647, %v1098_v44  ;;  %v2518_v63 = vand.u32 2147483648, %v1098_v44 }
 0x21f   :  { %1506 = vrot.lane.b32.xlu0 %v1317_v47, %s2731_s3  ;;  %v2516_v26 = vcvt.s32.f32 %v2515_v53  ;;  %v2507_v39 = vcvt.f32.s32 %v1097_v54  ;;  %v2505_v56 = vand.u32 2147483647, %v1097_v54  ;;  %v2510_v3 = vand.u32 2147483648, %v1097_v54 }
 0x220   :  { %vm2514_vm9 = vcmp.lt.f32.partialorder %v2513_v43, 8388608.0 }
 0x221   :  { %v2517_v45 = vand.u32 2147483647, %v2516_v26  ;;  %v2508_v29 = vcvt.s32.f32 %v2507_v39  ;;  %vm2506_vm10 = vcmp.lt.f32.partialorder %v2505_v56, 8388608.0 }
 0x223   :  { %v2519_v1 = vor.u32 %v2518_v63, %v2517_v45  ;;  %v2509_v2 = vand.u32 2147483647, %v2508_v29 }
 0x225   :  { %v2520_v48 = vsel %vm2514_vm9, %v2519_v1, %v1098_v44  ;;  %v2511_v52 = vor.u32 %v2510_v3, %v2509_v2  ;;  %v3761_v24 = vpop.permute.xlu1 %1404 }
 0x226   :  { %v1523_v11 = vpop.permute.xlu0 %1522  ;;  %1172 = vst.msk [vmem:[#allocation2 + $0xe1] sm:$0xff] %vm720_vm2, %v2520_v48  ;;  %v1591_v48 = vsel %vm720_vm2, %v3661_v23, %v3761_v24 }
 0x227   :  { %v2512_v55 = vsel %vm2506_vm10, %v2511_v52, %v1097_v54  ;;  %v1677_v13 = vsel %vm1675_vm12, %v1660_v46, %v1523_v11 }
 0x228   :  { %1171 = vst.msk [vmem:[#allocation2 + $0xd1] sm:$0xff] %vm720_vm2, %v2512_v55 }
 0x229   :  { %v1429_v10 = vpop.permute.xlu1 %1428 }
 0x22a   :  { %v1547_v37 = vpop.permute.xlu0 %1546  ;;  %v1613_v55 = vsel %vm754_vm4, %v1591_v48, %v1429_v10 }
 0x22b   :  { %v1694_v19 = vsel %vm1692_vm13, %v1677_v13, %v1547_v37 }
 0x22d   :  { %v1453_v28 = vpop.permute.xlu1 %1452  ;;  %v3779_v35 = vld [vmem:[#allocation2 + $0xe0] sm:$0xff] }
 0x22e   :  { %v1571_v57 = vpop.permute.xlu0 %1570  ;;  %v3787_v38 = vld [vmem:[#allocation2 + $0xe1] sm:$0xff]  ;;  %v1629_v12 = vsel %vm788_vm6, %v1613_v55, %v1453_v28 }
 0x22f   :  { %v1711_v20 = vsel %vm1709_vm14, %v1694_v19, %v1571_v57  ;;  %v1212_v0 = vld [vmem:[#allocation2 + $0xd1] sm:$0xff]  ;;  %v1308_v47 = vld [vmem:[#allocation2 + $0xe2] sm:$0xff] }
 0x230   :  { %2406 = vmatprep.mubr.msk.bf16.mxu1 %vm1762_vm15, %v1711_v20  ;;  %v1331_v7 = vld [vmem:[#allocation2 + $0xd0] sm:$0xff]  ;;  %v1222_v27 = vpack.c.bf16 %v1212_v0, %v1282_v31  ;;  %v1294_v25 = vpack.c.bf16 %v3787_v38, %v1212_v0 }
 0x231   :  { %v3770_v61 = vpack.c.bf16 %v1331_v7, %v3742_v30  ;;  %v1236_v15 = vld [vmem:[#allocation2 + $0xd2] sm:$0xff]  ;;  %v1270_v9 = vpack.c.bf16 %v3779_v35, %v1331_v7  ;;  %v1477_v17 = vpop.permute.xlu1 %1476 }
 0x232   :  { %1412 = vrot.lane.b32.xlu1 %v1222_v27, %s2722_s0  ;;  %v1246_v16 = vpack.c.bf16 %v1236_v15, %v1306_v36  ;;  %v1318_v54 = vpack.c.bf16 %v1308_v47, %v1236_v15 }
 0x233   :  { %1530 = vrot.lane.b32.xlu0 %v3770_v61, %s2732_s15 }
 0x234   :  { %v2392_v18 = vpop.f32.mrf.mxu0 }
 0x235   :  { %v1036_v5 = vadd.f32 %v2392_v18, %v3612_v58  ;;  %v1501_v43 = vpop.permute.xlu1 %1500 }
 0x236   :  { %v1030_v32 = vpop.f32.mrf.mxu0  ;;  %1436 = vrot.lane.b32.xlu1 %v1246_v16, %s2725_s24 }
 0x237   :  { %1554 = vrot.lane.b32.xlu0 %v1222_v27, %s2733_s16  ;;  %v1062_v34 = vmax.f32 %v1036_v5, 0.0  ;;  %v1031_v30 = vadd.f32 %v3612_v58, %v1030_v32 }
 0x239   :  { %v1079_v8 = vmin.f32 %v3193_v62, %v1062_v34  ;;  %v1061_v40 = vmax.f32 %v1031_v30, 0.0 }
 0x23a   :  { %1460 = vrot.lane.b32.xlu1 %v1270_v9, %s2727_s21 }
 0x23b   :  { %1578 = vrot.lane.b32.xlu0 %v1246_v16, %s2734_s22  ;;  %v1100_v31 = vmul.f32 %v3623_v59, %v1079_v8  ;;  %v1078_v41 = vmin.f32 %v3193_v62, %v1061_v40 }
 0x23d   :  { %v2531_v42 = vcvt.f32.s32 %v1100_v31  ;;  %v1099_v44 = vmul.f32 %v3623_v59, %v1078_v41  ;;  %v2529_v53 = vand.u32 2147483647, %v1100_v31  ;;  %v2534_v39 = vand.u32 2147483648, %v1100_v31 }
 0x23e   :  { %1484 = vrot.lane.b32.xlu1 %v1294_v25, %s2729_s20 }
 0x23f   :  { %v2532_v50 = vcvt.s32.f32 %v2531_v42  ;;  %v2523_v36 = vcvt.f32.s32 %v1099_v44  ;;  %v2521_v60 = vand.u32 2147483647, %v1099_v44  ;;  %v2526_v1 = vand.u32 2147483648, %v1099_v44 }
 0x240   :  { %vm2530_vm0 = vcmp.lt.f32.partialorder %v2529_v53, 8388608.0  ;;  %v1337_v53 = vld [vmem:[#allocation2 + $0x130] sm:$0xff] }
 0x241   :  { %v2533_v26 = vand.u32 2147483647, %v2532_v50  ;;  %v2524_v45 = vcvt.s32.f32 %v2523_v36  ;;  %v2395_v63 = vpop.f32.mrf.mxu0  ;;  %vm2522_vm1 = vcmp.lt.f32.partialorder %v2521_v60, 8388608.0 }
 0x242   :  { %v1046_v29 = vadd.f32 %v2395_v63, %v3612_v58  ;;  %1508 = vrot.lane.b32.xlu1 %v1318_v54, %s2731_s3 }
 0x243   :  { %v2535_v21 = vor.u32 %v2534_v39, %v2533_v26  ;;  %v2525_v56 = vand.u32 2147483647, %v2524_v45  ;;  %v1040_v2 = vpop.f32.mrf.mxu0 }
 0x244   :  { %v1064_v3 = vmax.f32 %v1046_v29, 0.0  ;;  %v1041_v33 = vadd.f32 %v3612_v58, %v1040_v2  ;;  %v1645_v58 = vsel %vm822_vm8, %v1629_v12, %v1477_v17 }
 0x245   :  { %v2536_v52 = vsel %vm2530_vm0, %v2535_v21, %v1100_v31  ;;  %v2527_v11 = vor.u32 %v2526_v1, %v2525_v56  ;;  %v1525_v4 = vpop.permute.xlu1 %1524  ;;  %v1662_v13 = vsel %vm1658_vm11, %v1645_v58, %v1501_v43 }
 0x246   :  { %1174 = vst.msk [vmem:[#allocation2 + $0x101] sm:$0xff] %vm720_vm2, %v2536_v52  ;;  %v1081_v49 = vmin.f32 %v3193_v62, %v1064_v3  ;;  %v1063_v14 = vmax.f32 %v1041_v33, 0.0  ;;  %v1573_v37 = vpop.permute.xlu0 %1572  ;;  %v1679_v10 = vsel %vm1675_vm12, %v1662_v13, %v1525_v4 }
 0x247   :  { %v2528_v46 = vsel %vm2522_vm1, %v2527_v11, %v1099_v44 }
 0x248   :  { %1173 = vst.msk [vmem:[#allocation2 + $0xf1] sm:$0xff] %vm720_vm2, %v2528_v46  ;;  %v1102_v23 = vmul.f32 %v3623_v59, %v1081_v49  ;;  %v1080_v24 = vmin.f32 %v3193_v62, %v1063_v14 }
 0x249   :  { %v1549_v19 = vpop.permute.xlu1 %1548 }
 0x24a   :  { %v2547_v57 = vcvt.f32.s32 %v1102_v23  ;;  %v1101_v20 = vmul.f32 %v3623_v59, %v1080_v24  ;;  %v1696_v0 = vsel %vm1692_vm13, %v1679_v10, %v1549_v19  ;;  %v1431_v15 = vpop.permute.xlu0 %1430  ;;  %v2545_v18 = vand.u32 2147483647, %v1102_v23 }
 0x24b   :  { %v1713_v16 = vsel %vm1709_vm14, %v1696_v0, %v1573_v37  ;;  %v2550_v5 = vand.u32 2147483648, %v1102_v23 }
 0x24c   :  { %v2548_v7 = vcvt.s32.f32 %v2547_v57  ;;  %v2539_v27 = vcvt.f32.s32 %v1101_v20  ;;  %2407 = vmatmul.mubr.msk.bf16.vlgmr.msra.gmra.mxu1 %vm1762_vm15, %v1713_v16  ;;  %v2537_v62 = vand.u32 2147483647, %v1101_v20  ;;  %v2542_v8 = vand.u32 2147483648, %v1101_v20 }
 0x24d   :  { %vm2546_vm3 = vcmp.lt.f32.partialorder %v2545_v18, 8388608.0  ;;  %v1286_v39 = vld [vmem:[#allocation2 + $0x101] sm:$0xff]  ;;  %v1407_v63 = vpop.permute.xlu1 %1406  ;;  %v1361_v18 = vld [vmem:[#allocation2 + $0x131] sm:$0xff] }
 0x24e   :  { %v2549_v28 = vand.u32 2147483647, %v2548_v7  ;;  %v2540_v32 = vcvt.s32.f32 %v2539_v27  ;;  %v1455_v42 = vpop.permute.xlu0 %1454  ;;  %vm2538_vm5 = vcmp.lt.f32.partialorder %v2537_v62, 8388608.0  ;;  %v1310_v21 = vld [vmem:[#allocation2 + $0x102] sm:$0xff]  ;;  %v1594_v2 = vsel %vm720_vm2, %v3697_v6, %v1407_v63 }
 0x24f   :  { %v1333_v34 = vld [vmem:[#allocation2 + $0xf0] sm:$0xff]  ;;  %v1615_v4 = vsel %vm754_vm4, %v1594_v2, %v1431_v15  ;;  %v1185_v63 = vld [vmem:[#allocation2 + $0xa0] sm:$0xff] }
 0x250   :  { %v1381_v30 = vld [vmem:[#allocation2 + $0xf2] sm:$0xff]  ;;  %v2551_v59 = vor.u32 %v2550_v5, %v2549_v28  ;;  %v2541_v9 = vand.u32 2147483647, %v2540_v32  ;;  %v3815_v40 = vpack.c.bf16 %v1333_v34, %v3779_v35  ;;  %v3824_v35 = vstv %s3812_s4 }
 0x251   :  { %v1391_v17 = vpack.c.bf16 %v1381_v30, %v1308_v47  ;;  %v1357_v31 = vld [vmem:[#allocation2 + $0xf1] sm:$0xff]  ;;  %2705 = vrcp.f32 %v3824_v35  ;;  %v1262_v47 = vld [vmem:[#allocation2 + $0x100] sm:$0xff]  ;;  %v1319_v56 = vpack.c.bf16 %v1310_v21, %v1381_v30  ;;  %v1631_v6 = vsel %vm788_vm6, %v1615_v4, %v1455_v42 }
 0x252   :  { %v2552_v41 = vsel %vm2546_vm3, %v2551_v59, %v1102_v23  ;;  %v2543_v25 = vor.u32 %v2542_v8, %v2541_v9  ;;  %1532 = vrot.lane.b32.xlu1 %v3815_v40, %s2732_s15  ;;  %v1367_v50 = vpack.c.bf16 %v1357_v31, %v3787_v38  ;;  %v1479_v36 = vpop.permute.xlu0 %1478  ;;  %v1271_v54 = vpack.c.bf16 %v1262_v47, %v1333_v34  ;;  %v2312_v15 = vld [vmem:[%s4163_s1 + $0x1b0] sm:$0xff] }
 0x253   :  { %1176 = vst.msk [vmem:[#allocation2 + $0x121] sm:$0xff] %vm720_vm2, %v2552_v41  ;;  %1580 = vrot.lane.b32.xlu0 %v1391_v17, %s2734_s22  ;;  %v1295_v43 = vpack.c.bf16 %v1286_v39, %v1357_v31  ;;  %v1647_v58 = vsel %vm822_vm8, %v1631_v6, %v1479_v36  ;;  %v2314_v5 = vld [vmem:[%s4163_s1 + $0x1d0] sm:$0xff]  ;;  %v2315_v36 = vld [vmem:[%s4163_s1 + $0x1e0] sm:$0xff] }
 0x254   :  { %v2544_v44 = vsel %vm2538_vm5, %v2543_v25, %v1101_v20  ;;  %v1385_v32 = vld [vmem:[#allocation2 + $0x132] sm:$0xff] }
 0x255   :  { %1175 = vst.msk [vmem:[#allocation2 + $0x111] sm:$0xff] %vm720_vm2, %v2544_v44  ;;  %v2316_v9 = vld [vmem:[%s4163_s1 + $0x1f0] sm:$0xff] }
 0x256   :  { %1556 = vrot.lane.b32.xlu1 %v1367_v50, %s2733_s16  ;;  %v1503_v60 = vpop.permute.xlu0 %1502  ;;  %v2318_v42 = vld [vmem:[%s4163_s1 + $0x210] sm:$0xff] }
 0x257   :  { %1438 = vrot.lane.b32.xlu0 %v1391_v17, %s2725_s24  ;;  %v1664_v24 = vsel %vm1658_vm11, %v1647_v58, %v1503_v60  ;;  %v2324_v6 = vld [vmem:[%s4163_s1 + $0x430] sm:$0xff] }
 0x258   :  { %v2326_v58 = vld [vmem:[%s4163_s1 + $0x450] sm:$0xff] }
 0x25a   :  { %1414 = vrot.lane.b32.xlu1 %v1367_v50, %s2722_s0  ;;  %v1336_v26 = vld [vmem:[#allocation2 + $0x120] sm:$0xff] }
 0x25b   :  { %1462 = vrot.lane.b32.xlu0 %v1271_v54, %s2727_s21  ;;  %v1345_v38 = vpack.c.bf16 %v1337_v53, %v1336_v26  ;;  %v1288_v23 = vld [vmem:[#allocation2 + $0x121] sm:$0xff] }
 0x25c   :  { %v1216_v45 = vld [vmem:[#allocation2 + $0x111] sm:$0xff]  ;;  %v1312_v7 = vld [vmem:[#allocation2 + $0x122] sm:$0xff]  ;;  %v1369_v28 = vpack.c.bf16 %v1361_v18, %v1288_v23 }
 0x25d   :  { %v1224_v29 = vpack.c.bf16 %v1216_v45, %v1286_v39  ;;  %v1240_v1 = vld [vmem:[#allocation2 + $0x112] sm:$0xff]  ;;  %v1296_v13 = vpack.c.bf16 %v1288_v23, %v1216_v45  ;;  %v1393_v59 = vpack.c.bf16 %v1385_v32, %v1312_v7  ;;  %v2319_v53 = vld [vmem:[%s4163_s1 + $0x220] sm:$0xff] }
 0x25e   :  { %1536 = vrot.lane.b32.xlu1 %v1345_v38, %s2732_s15  ;;  %v1335_v48 = vld [vmem:[#allocation2 + $0x110] sm:$0xff]  ;;  %v2706_v52 = vpop.eup %2705  ;;  %v1248_v11 = vpack.c.bf16 %v1240_v1, %v1310_v21  ;;  %v1320_v27 = vpack.c.bf16 %v1312_v7, %v1240_v1  ;;  %v1197_v21 = vpack.c.bf16 %v3738_v22, %v1185_v63  ;;  %v2327_v7 = vld [vmem:[%s4163_s1 + $0x460] sm:$0xff] }
 0x25f   :  { %1486 = vrot.lane.b32.xlu0 %v1295_v43, %s2729_s20  ;;  %2553 = vpush %v2706_v52  ;;  %v3838_v55 = vpack.c.bf16 %v1335_v48, %v1262_v47  ;;  %v1272_v37 = vpack.c.bf16 %v1336_v26, %v1335_v48  ;;  %v2317_v47 = vld [vmem:[%s4163_s1 + $0x200] sm:$0xff]  ;;  %v2320_v39 = vld [vmem:[%s4163_s1 + $0x3f0] sm:$0xff] }
 0x260   :  { %v2321_v43 = vld [vmem:[%s4163_s1 + $0x400] sm:$0xff]  ;;  %v2322_v45 = vld [vmem:[%s4163_s1 + $0x410] sm:$0xff] }
 0x262   :  { %1416 = vrot.lane.b32.xlu1 %v1224_v29, %s2722_s0  ;;  %v1529_v3 = vpop.permute.xlu1 %1528 }
 0x263   :  { %v1577_v33 = vpop.permute.xlu0 %1576  ;;  %1510 = vrot.lane.b32.xlu0 %v1319_v56, %s2731_s3  ;;  %v2323_v56 = vld [vmem:[%s4163_s1 + $0x420] sm:$0xff] }
 0x266   :  { %1440 = vrot.lane.b32.xlu1 %v1248_v11, %s2725_s24  ;;  %v1553_v49 = vpop.permute.xlu1 %1552 }
 0x267   :  { %v1527_v14 = vpop.permute.xlu0 %1526  ;;  %1534 = vrot.lane.b32.xlu0 %v3838_v55, %s2732_s15 }
 0x268   :  { %v1681_v19 = vsel %vm1675_vm12, %v1664_v24, %v1527_v14 }
 0x26a   :  { %1464 = vrot.lane.b32.xlu1 %v1272_v37, %s2727_s21  ;;  %v1409_v12 = vpop.permute.xlu1 %1408  ;;  %s2735_s21 = smov 2   ;;  %v2325_v37 = vld [vmem:[%s4163_s1 + $0x440] sm:$0xff] }
 0x26b   :  { %v1551_v46 = vpop.permute.xlu0 %1550  ;;  %1558 = vrot.lane.b32.xlu0 %v1224_v29, %s2733_s16  ;;  %v1597_v34 = vsel %vm720_vm2, %v3718_v51, %v1409_v12  ;;  %v2313_v51 = vld [vmem:[%s4163_s1 + $0x1c0] sm:$0xff] }
 0x26c   :  { %v1698_v57 = vsel %vm1692_vm13, %v1681_v19, %v1551_v46 }
 0x26e   :  { %1488 = vrot.lane.b32.xlu1 %v1296_v13, %s2729_s20  ;;  %v1433_v20 = vpop.permute.xlu1 %1432 }
 0x26f   :  { %v1575_v10 = vpop.permute.xlu0 %1574  ;;  %1582 = vrot.lane.b32.xlu0 %v1248_v11, %s2734_s22  ;;  %v1617_v30 = vsel %vm754_vm4, %v1597_v34, %v1433_v20 }
 0x270   :  { %v1715_v0 = vsel %vm1709_vm14, %v1698_v57, %v1575_v10 }
 0x271   :  { %2410 = vmatprep.mubr.msk.bf16.mxu1 %vm1762_vm15, %v1715_v0 }
 0x272   :  { %1512 = vrot.lane.b32.xlu1 %v1320_v27, %s2731_s3  ;;  %v1457_v16 = vpop.permute.xlu1 %1456 }
 0x273   :  { %1957 = vrot.lane.b32.xlu0 %v2312_v15, %s2735_s21  ;;  %v1633_v8 = vsel %vm788_vm6, %v1617_v30, %v1457_v16 }
 0x276   :  { %1560 = vrot.lane.b32.xlu1 %v1369_v28, %s2733_s16  ;;  %v1481_v62 = vpop.permute.xlu1 %1480 }
 0x277   :  { %1961 = vrot.lane.b32.xlu0 %v2314_v5, %s2735_s21  ;;  %v1649_v17 = vsel %vm822_vm8, %v1633_v8, %v1481_v62 }
 0x27a   :  { %1584 = vrot.lane.b32.xlu1 %v1393_v59, %s2734_s22  ;;  %v1505_v31 = vpop.permute.xlu1 %1504 }
 0x27b   :  { %v1666_v41 = vsel %vm1658_vm11, %v1649_v17, %v1505_v31  ;;  %1965 = vrot.lane.b32.xlu0 %v2316_v9, %s2735_s21 }
 0x27c   :  { %v1683_v25 = vsel %vm1675_vm12, %v1666_v41, %v1529_v3 }
 0x27d   :  { %v1700_v44 = vsel %vm1692_vm13, %v1683_v25, %v1553_v49 }
 0x27e   :  { %v1717_v50 = vsel %vm1709_vm14, %v1700_v44, %v1577_v33  ;;  %1959 = vrot.lane.b32.xlu1 %v2313_v51, %s2735_s21 }
 0x27f   :  { %2411 = vmatmul.mubr.msk.bf16.gmra.mxu1 %vm1762_vm15, %v1717_v50  ;;  %1969 = vrot.lane.b32.xlu0 %v2318_v42, %s2735_s21 }
 0x282   :  { %1963 = vrot.lane.b32.xlu1 %v2315_v36, %s2735_s21 }
 0x283   :  { %1973 = vrot.lane.b32.xlu0 %v2320_v39, %s2735_s21 }
 0x284   :  { %v1411_v29 = vpop.permute.xlu1 %1410 }
 0x285   :  { %v1435_v54 = vpop.permute.xlu0 %1434  ;;  %v1600_v1 = vsel %vm720_vm2, %v1197_v21, %v1411_v29 }
 0x286   :  { %1967 = vrot.lane.b32.xlu1 %v2317_v47, %s2735_s21  ;;  %v1619_v3 = vsel %vm754_vm4, %v1600_v1, %v1435_v54 }
 0x287   :  { %1977 = vrot.lane.b32.xlu0 %v2322_v45, %s2735_s21 }
 0x289   :  { %v1459_v26 = vpop.permute.xlu0 %1458 }
 0x28a   :  { %1971 = vrot.lane.b32.xlu1 %v2319_v53, %s2735_s21  ;;  %v1635_v33 = vsel %vm788_vm6, %v1619_v3, %v1459_v26 }
 0x28b   :  { %1981 = vrot.lane.b32.xlu0 %v2324_v6, %s2735_s21 }
 0x28d   :  { %v1483_v38 = vpop.permute.xlu0 %1482 }
 0x28e   :  { %1975 = vrot.lane.b32.xlu1 %v2321_v43, %s2735_s21  ;;  %v1651_v11 = vsel %vm822_vm8, %v1635_v33, %v1483_v38  ;;  %v3974_v33 = vld [vmem:[%s4167_s5] ss:$0 sm:$0xff] }
 0x28f   :  { %1985 = vrot.lane.b32.xlu0 %v2326_v58, %s2735_s21 }
 0x290   :  { %s2554_s13 = spop %2553 }
 0x291   :  { %v1507_v60 = vpop.permute.xlu0 %1506  ;;  %s2091_s5 = smul.f32 3.0, %s2554_s13 }
 0x292   :  { %1979 = vrot.lane.b32.xlu1 %v2323_v56, %s2735_s21  ;;  %v1668_v4 = vsel %vm1658_vm11, %v1651_v11, %v1507_v60  ;;  %v3980_v11 = vld [vmem:[%s4168_s6] ss:$0 sm:$0xff]  ;;  %s2127_s6 = smul.f32 0.33333334, %s3812_s4 }
 0x296   :  { %1983 = vrot.lane.b32.xlu1 %v2325_v37, %s2735_s21 }
 0x29a   :  { %1987 = vrot.lane.b32.xlu1 %v2327_v7, %s2735_s21 }
 0x2a4   :  { %v1413_v48 = vpop.permute.xlu1 %1412 }
 0x2a5   :  { %v1531_v2 = vpop.permute.xlu0 %1530  ;;  %v1603_v19 = vsel %vm720_vm2, %v3770_v61, %v1413_v48 }
 0x2a6   :  { %v1685_v22 = vsel %vm1675_vm12, %v1668_v4, %v1531_v2 }
 0x2a8   :  { %v1437_v46 = vpop.permute.xlu1 %1436 }
 0x2a9   :  { %v1555_v52 = vpop.permute.xlu0 %1554  ;;  %v1621_v57 = vsel %vm754_vm4, %v1603_v19, %v1437_v46 }
 0x2aa   :  { %v1702_v49 = vsel %vm1692_vm13, %v1685_v22, %v1555_v52 }
 0x2ac   :  { %v1461_v23 = vpop.permute.xlu1 %1460 }
 0x2ad   :  { %v1579_v14 = vpop.permute.xlu0 %1578  ;;  %v1637_v10 = vsel %vm788_vm6, %v1621_v57, %v1461_v23 }
 0x2ae   :  { %v1719_v12 = vsel %vm1709_vm14, %v1702_v49, %v1579_v14 }
 0x2af   :  { %2414 = vmatprep.mubr.msk.bf16.mxu1 %vm1762_vm15, %v1719_v12 }
 0x2b0   :  { %v1485_v24 = vpop.permute.xlu1 %1484 }
 0x2b1   :  { %v1653_v27 = vsel %vm822_vm8, %v1637_v10, %v1485_v24 }
 0x2b4   :  { %v1509_v13 = vpop.permute.xlu1 %1508 }
 0x2b5   :  { %v1670_v15 = vsel %vm1658_vm11, %v1653_v27, %v1509_v13 }
 0x2c4   :  { %v1533_v20 = vpop.permute.xlu1 %1532 }
 0x2c5   :  { %v1581_v0 = vpop.permute.xlu0 %1580  ;;  %v1687_v18 = vsel %vm1675_vm12, %v1670_v15, %v1533_v20 }
 0x2c8   :  { %v1557_v16 = vpop.permute.xlu1 %1556 }
 0x2c9   :  { %v1704_v61 = vsel %vm1692_vm13, %v1687_v18, %v1557_v16  ;;  %v1439_v28 = vpop.permute.xlu0 %1438  ;;  %v3996_v16 = vstv %s2091_s5 }
 0x2ca   :  { %v1721_v5 = vsel %vm1709_vm14, %v1704_v61, %v1581_v0 }
 0x2cb   :  { %2415 = vmatmul.mubr.msk.bf16.gmra.mxu1 %vm1762_vm15, %v1721_v5 }
 0x2cc   :  { %v1415_v32 = vpop.permute.xlu1 %1414 }
 0x2cd   :  { %v1463_v62 = vpop.permute.xlu0 %1462  ;;  %v1606_v9 = vsel %vm720_vm2, %v3815_v40, %v1415_v32 }
 0x2ce   :  { %v1623_v17 = vsel %vm754_vm4, %v1606_v9, %v1439_v28 }
 0x2cf   :  { %v1639_v51 = vsel %vm788_vm6, %v1623_v17, %v1463_v62 }
 0x2d0   :  { %v1537_v34 = vpop.permute.xlu1 %1536 }
 0x2d1   :  { %v1487_v30 = vpop.permute.xlu0 %1486 }
 0x2d2   :  { %v1655_v44 = vsel %vm822_vm8, %v1639_v51, %v1487_v30 }
 0x2d4   :  { %v1417_v59 = vpop.permute.xlu1 %1416 }
 0x2d5   :  { %v1511_v8 = vpop.permute.xlu0 %1510  ;;  %v1609_v26 = vsel %vm720_vm2, %v3838_v55, %v1417_v59 }
 0x2d6   :  { %v1672_v50 = vsel %vm1658_vm11, %v1655_v44, %v1511_v8 }
 0x2d8   :  { %v1441_v31 = vpop.permute.xlu1 %1440 }
 0x2d9   :  { %v1535_v41 = vpop.permute.xlu0 %1534  ;;  %v1625_v39 = vsel %vm754_vm4, %v1609_v26, %v1441_v31  ;;  %vm2022_vm4 = vcmask 48128  }
 0x2da   :  { %v1689_v36 = vsel %vm1675_vm12, %v1672_v50, %v1535_v41 }
 0x2dc   :  { %v1465_v25 = vpop.permute.xlu1 %1464 }
 0x2dd   :  { %v1559_v42 = vpop.permute.xlu0 %1558  ;;  %v1641_v43 = vsel %vm788_vm6, %v1625_v39, %v1465_v25 }
 0x2de   :  { %v1706_v53 = vsel %vm1692_vm13, %v1689_v36, %v1559_v42 }
 0x2e0   :  { %v1489_v47 = vpop.permute.xlu1 %1488 }
 0x2e1   :  { %v1583_v54 = vpop.permute.xlu0 %1582  ;;  %v1657_v45 = vsel %vm822_vm8, %v1641_v43, %v1489_v47 }
 0x2e2   :  { %v1723_v40 = vsel %vm1709_vm14, %v1706_v53, %v1583_v54 }
 0x2e3   :  { %2418 = vmatprep.mubr.msk.bf16.mxu1 %vm1762_vm15, %v1723_v40 }
 0x2e4   :  { %v1513_v38 = vpop.permute.xlu1 %1512 }
 0x2e5   :  { %v1674_v63 = vsel %vm1658_vm11, %v1657_v45, %v1513_v38  ;;  %v1958_v55 = vpop.permute.xlu0 %1957 }
 0x2e6   :  { %v1691_v29 = vsel %vm1675_vm12, %v1674_v63, %v1537_v34  ;;  %v2006_v22 = vsel %vm2005_vm7, 0.0, %v1958_v55  ;;  %v4008_v63 = vstv %s2127_s6 }
 0x2e7   :  { %v2023_v58 = vsel %vm2022_vm4, %v2006_v22, 0.0 }
 0x2e8   :  { %v1561_v60 = vpop.permute.xlu1 %1560 }
 0x2e9   :  { %v1708_v21 = vsel %vm1692_vm13, %v1691_v29, %v1561_v60  ;;  %v1962_v3 = vpop.permute.xlu0 %1961 }
 0x2ea   :  { %v2008_v48 = vsel %vm2005_vm7, 0.0, %v1962_v3 }
 0x2eb   :  { %v2025_v14 = vsel %vm2022_vm4, %v2008_v48, 0.0 }
 0x2ec   :  { %v1585_v56 = vpop.permute.xlu1 %1584 }
 0x2ed   :  { %v1725_v1 = vsel %vm1709_vm14, %v1708_v21, %v1585_v56 }
 0x2ee   :  { %2419 = vmatmul.mubr.msk.bf16.gmra.mxu1 %vm1762_vm15, %v1725_v1 }
 0x2f0   :  { %v1960_v2 = vpop.permute.xlu1 %1959 }
 0x2f1   :  { %v2007_v24 = vsel %vm2005_vm7, 0.0, %v1960_v2 }
 0x2f2   :  { %v2024_v18 = vsel %vm2022_vm4, %v2007_v24, 0.0 }
 0x2f4   :  { %v1964_v4 = vpop.permute.xlu1 %1963 }
 0x2f5   :  { %v2009_v46 = vsel %vm2005_vm7, 0.0, %v1964_v4 }
 0x2f6   :  { %v2026_v20 = vsel %vm2022_vm4, %v2009_v46, 0.0 }
 0x30c   :  { %v2408_v52 = vpop.f32.mrf.mxu1 }
 0x30d   :  { %v1888_v49 = vmul.f32 %v2408_v52, %v3974_v33 }
 0x30e   :  { %v1816_v6 = vpop.f32.mrf.mxu1 }
 0x30f   :  { %v1911_v37 = vadd.f32 %v3980_v11, %v1888_v49  ;;  %v1886_v12 = vmul.f32 %v3974_v33, %v1816_v6 }
 0x310   :  { %v2409_v23 = vpop.f32.mrf.mxu1 }
 0x311   :  { %v2041_v13 = vadd.f32 %v2025_v14, %v1911_v37  ;;  %v1909_v19 = vadd.f32 %v3980_v11, %v1886_v12  ;;  %v1889_v57 = vmul.f32 %v2409_v23, %v3974_v33  ;;  %v1968_v23 = vpop.permute.xlu1 %1967 }
 0x312   :  { %v1819_v10 = vpop.f32.mrf.mxu1 }
 0x313   :  { %v2057_v0 = vmax.f32 %v2041_v13, 0.0  ;;  %v2039_v7 = vadd.f32 %v2023_v58, %v1909_v19  ;;  %v1912_v27 = vadd.f32 %v3980_v11, %v1889_v57  ;;  %v1887_v15 = vmul.f32 %v3974_v33, %v1819_v10  ;;  %v1966_v58 = vpop.permute.xlu0 %1965 }
 0x315   :  { %v2074_v61 = vmin.f32 %v3824_v35, %v2057_v0  ;;  %v2055_v28 = vmax.f32 %v2039_v7, 0.0  ;;  %v2042_v5 = vadd.f32 %v2026_v20, %v1912_v27  ;;  %v1910_v32 = vadd.f32 %v3980_v11, %v1887_v15  ;;  %v1972_v57 = vpop.permute.xlu1 %1971 }
 0x316   :  { %v2010_v20 = vsel %vm2005_vm7, 0.0, %v1966_v58 }
 0x317   :  { %v2072_v62 = vmin.f32 %v3824_v35, %v2055_v28  ;;  %v2058_v34 = vmax.f32 %v2042_v5, 0.0  ;;  %v2040_v30 = vadd.f32 %v2024_v18, %v1910_v32  ;;  %v2095_v59 = vmul.f32 %v3996_v16, %v2074_v61  ;;  %v1970_v24 = vpop.permute.xlu0 %1969 }
 0x318   :  { %v2012_v13 = vsel %vm2005_vm7, 0.0, %v1970_v24  ;;  %v2013_v18 = vsel %vm2005_vm7, 0.0, %v1972_v57  ;;  %v2027_v61 = vsel %vm2022_vm4, %v2010_v20, 0.0  ;;  %v2011_v5 = vsel %vm2005_vm7, 0.0, %v1968_v23 }
 0x319   :  { %v2075_v9 = vmin.f32 %v3824_v35, %v2058_v34  ;;  %v2056_v8 = vmax.f32 %v2040_v30, 0.0  ;;  %v2093_v17 = vmul.f32 %v3996_v16, %v2072_v62  ;;  %v2573_v31 = vcvt.f32.s32 %v2095_v59 }
 0x31a   :  { %v2571_v42 = vand.u32 2147483647, %v2095_v59  ;;  %v2576_v54 = vand.u32 2147483648, %v2095_v59  ;;  %v2029_v0 = vsel %vm2022_vm4, %v2012_v13, 0.0  ;;  %v2030_v30 = vsel %vm2022_vm4, %v2013_v18, 0.0 }
 0x31b   :  { %v2073_v41 = vmin.f32 %v3824_v35, %v2056_v8  ;;  %v2096_v51 = vmul.f32 %v3996_v16, %v2075_v9  ;;  %v2557_v25 = vcvt.f32.s32 %v2093_v17  ;;  %v2574_v44 = vcvt.s32.f32 %v2573_v31 }
 0x31c   :  { %v2555_v36 = vand.u32 2147483647, %v2093_v17  ;;  %v2560_v38 = vand.u32 2147483648, %v2093_v17  ;;  %vm2572_vm6 = vcmp.lt.f32.partialorder %v2571_v42, 8388608.0 }
 0x31d   :  { %v2094_v50 = vmul.f32 %v3996_v16, %v2073_v41  ;;  %v2558_v47 = vcvt.s32.f32 %v2557_v25  ;;  %v2575_v53 = vand.u32 2147483647, %v2574_v44  ;;  %v2581_v40 = vcvt.f32.s32 %v2096_v51 }
 0x31e   :  { %vm2556_vm8 = vcmp.lt.f32.partialorder %v2555_v36, 8388608.0  ;;  %v2579_v21 = vand.u32 2147483647, %v2096_v51  ;;  %v2584_v2 = vand.u32 2147483648, %v2096_v51  ;;  %v2028_v41 = vsel %vm2022_vm4, %v2011_v5, 0.0 }
 0x31f   :  { %v2559_v26 = vand.u32 2147483647, %v2558_v47  ;;  %v2565_v39 = vcvt.f32.s32 %v2094_v50  ;;  %v2577_v43 = vor.u32 %v2576_v54, %v2575_v53  ;;  %v2582_v45 = vcvt.s32.f32 %v2581_v40 }
 0x320   :  { %v2563_v56 = vand.u32 2147483647, %v2094_v50  ;;  %v2568_v52 = vand.u32 2147483648, %v2094_v50  ;;  %vm2580_vm9 = vcmp.lt.f32.partialorder %v2579_v21, 8388608.0 }
 0x321   :  { %v2561_v60 = vor.u32 %v2560_v38, %v2559_v26  ;;  %v2566_v29 = vcvt.s32.f32 %v2565_v39  ;;  %v2578_v1 = vsel %vm2572_vm6, %v2577_v43, %v2095_v59  ;;  %v2583_v55 = vand.u32 2147483647, %v2582_v45 }
 0x322   :  { %v2131_v4 = vmul.f32 %v2578_v1, %v4008_v63  ;;  %vm2564_vm10 = vcmp.lt.f32.partialorder %v2563_v56, 8388608.0 }
 0x323   :  { %v2562_v3 = vsel %vm2556_vm8, %v2561_v60, %v2093_v17  ;;  %v2567_v48 = vand.u32 2147483647, %v2566_v29  ;;  %v2585_v22 = vor.u32 %v2584_v2, %v2583_v55 }
 0x324   :  { %v2129_v49 = vmul.f32 %v2562_v3, %v4008_v63  ;;  %2147 = vst.msk [vmem:[%s4169_s7 + $0x10] sm:$0xff] %vm720_vm2, %v2131_v4 }
 0x325   :  { %v2569_v14 = vor.u32 %v2568_v52, %v2567_v48  ;;  %v2586_v6 = vsel %vm2580_vm9, %v2585_v22, %v2096_v51 }
 0x326   :  { %2145 = vst.msk [vmem:[%s4169_s7] sm:$0xff] %vm720_vm2, %v2129_v49  ;;  %v2132_v12 = vmul.f32 %v2586_v6, %v4008_v63 }
 0x327   :  { %v2570_v37 = vsel %vm2564_vm10, %v2569_v14, %v2094_v50 }
 0x328   :  { %v2130_v46 = vmul.f32 %v2570_v37, %v4008_v63  ;;  %2148 = vst.msk [vmem:[%s4169_s7 + $0x18] sm:$0xff] %vm720_vm2, %v2132_v12 }
 0x32a   :  { %2146 = vst.msk [vmem:[%s4169_s7 + $0x8] sm:$0xff] %vm720_vm2, %v2130_v46 }
 0x33f   :  { %v2412_v19 = vpop.f32.mrf.mxu1 }
 0x340   :  { %v1892_v10 = vmul.f32 %v2412_v19, %v3974_v33 }
 0x341   :  { %v1832_v7 = vpop.f32.mrf.mxu1 }
 0x342   :  { %v1915_v27 = vadd.f32 %v3980_v11, %v1892_v10  ;;  %v1890_v15 = vmul.f32 %v3974_v33, %v1832_v7 }
 0x343   :  { %v2413_v28 = vpop.f32.mrf.mxu1 }
 0x344   :  { %v2045_v32 = vadd.f32 %v2029_v0, %v1915_v27  ;;  %v1913_v62 = vadd.f32 %v3980_v11, %v1890_v15  ;;  %v1893_v34 = vmul.f32 %v2413_v28, %v3974_v33  ;;  %v1976_v28 = vpop.permute.xlu1 %1975 }
 0x345   :  { %v1835_v59 = vpop.f32.mrf.mxu1 }
 0x346   :  { %v2061_v9 = vmax.f32 %v2045_v32, 0.0  ;;  %v2043_v8 = vadd.f32 %v2027_v61, %v1913_v62  ;;  %v1916_v17 = vadd.f32 %v3980_v11, %v1893_v34  ;;  %v1891_v31 = vmul.f32 %v3974_v33, %v1835_v59  ;;  %v1974_v61 = vpop.permute.xlu0 %1973 }
 0x348   :  { %v2078_v51 = vmin.f32 %v3824_v35, %v2061_v9  ;;  %v2059_v25 = vmax.f32 %v2043_v8, 0.0  ;;  %v2046_v42 = vadd.f32 %v2030_v30, %v1916_v17  ;;  %v1914_v44 = vadd.f32 %v3980_v11, %v1891_v31  ;;  %v1980_v34 = vpop.permute.xlu1 %1979 }
 0x349   :  { %v2014_v30 = vsel %vm2005_vm7, 0.0, %v1974_v61 }
 0x34a   :  { %v2099_v50 = vmul.f32 %v3996_v16, %v2078_v51  ;;  %v2076_v36 = vmin.f32 %v3824_v35, %v2059_v25  ;;  %v2062_v47 = vmax.f32 %v2046_v42, 0.0  ;;  %v2044_v53 = vadd.f32 %v2028_v41, %v1914_v44  ;;  %v1978_v5 = vpop.permute.xlu0 %1977 }
 0x34b   :  { %v2016_v32 = vsel %vm2005_vm7, 0.0, %v1978_v5  ;;  %v2017_v41 = vsel %vm2005_vm7, 0.0, %v1980_v34  ;;  %v2031_v51 = vsel %vm2022_vm4, %v2014_v30, 0.0  ;;  %v2015_v42 = vsel %vm2005_vm7, 0.0, %v1976_v28 }
 0x34c   :  { %v2605_v54 = vcvt.f32.s32 %v2099_v50  ;;  %v2097_v40 = vmul.f32 %v3996_v16, %v2076_v36  ;;  %v2079_v26 = vmin.f32 %v3824_v35, %v2062_v47  ;;  %v2060_v38 = vmax.f32 %v2044_v53, 0.0 }
 0x34d   :  { %v2603_v45 = vand.u32 2147483647, %v2099_v50  ;;  %v2608_v56 = vand.u32 2147483648, %v2099_v50  ;;  %v2033_v9 = vsel %vm2022_vm4, %v2016_v32, 0.0  ;;  %v2034_v47 = vsel %vm2022_vm4, %v2017_v41, 0.0 }
 0x34e   :  { %v2606_v39 = vcvt.s32.f32 %v2605_v54  ;;  %v2589_v43 = vcvt.f32.s32 %v2097_v40  ;;  %v2100_v60 = vmul.f32 %v3996_v16, %v2079_v26  ;;  %v2077_v29 = vmin.f32 %v3824_v35, %v2060_v38 }
 0x34f   :  { %v2587_v1 = vand.u32 2147483647, %v2097_v40  ;;  %v2592_v4 = vand.u32 2147483648, %v2097_v40  ;;  %vm2604_vm11 = vcmp.lt.f32.partialorder %v2603_v45, 8388608.0 }
 0x350   :  { %v2607_v21 = vand.u32 2147483647, %v2606_v39  ;;  %v2590_v55 = vcvt.s32.f32 %v2589_v43  ;;  %v2613_v2 = vcvt.f32.s32 %v2100_v60  ;;  %v2098_v3 = vmul.f32 %v3996_v16, %v2077_v29 }
 0x351   :  { %vm2588_vm12 = vcmp.lt.f32.partialorder %v2587_v1, 8388608.0  ;;  %v2611_v37 = vand.u32 2147483647, %v2100_v60  ;;  %v2616_v58 = vand.u32 2147483648, %v2100_v60  ;;  %v2032_v39 = vsel %vm2022_vm4, %v2015_v42, 0.0 }
 0x352   :  { %v2609_v48 = vor.u32 %v2608_v56, %v2607_v21  ;;  %v2591_v52 = vand.u32 2147483647, %v2590_v55  ;;  %v2614_v22 = vcvt.s32.f32 %v2613_v2  ;;  %v2597_v49 = vcvt.f32.s32 %v2098_v3 }
 0x353   :  { %v2595_v13 = vand.u32 2147483647, %v2098_v3  ;;  %v2600_v10 = vand.u32 2147483648, %v2098_v3  ;;  %vm2612_vm13 = vcmp.lt.f32.partialorder %v2611_v37, 8388608.0 }
 0x354   :  { %v2610_v14 = vsel %vm2604_vm11, %v2609_v48, %v2099_v50  ;;  %v2593_v6 = vor.u32 %v2592_v4, %v2591_v52  ;;  %v2615_v46 = vand.u32 2147483647, %v2614_v22  ;;  %v2598_v23 = vcvt.s32.f32 %v2597_v49 }
 0x355   :  { %v2135_v12 = vmul.f32 %v2610_v14, %v4008_v63  ;;  %vm2596_vm14 = vcmp.lt.f32.partialorder %v2595_v13, 8388608.0 }
 0x356   :  { %v2594_v24 = vsel %vm2588_vm12, %v2593_v6, %v2097_v40  ;;  %v2617_v57 = vor.u32 %v2616_v58, %v2615_v46  ;;  %v2599_v20 = vand.u32 2147483647, %v2598_v23 }
 0x357   :  { %2151 = vst.msk [vmem:[%s4169_s7 + $0x30] sm:$0xff] %vm720_vm2, %v2135_v12  ;;  %v2133_v19 = vmul.f32 %v2594_v24, %v4008_v63 }
 0x358   :  { %v2618_v0 = vsel %vm2612_vm13, %v2617_v57, %v2100_v60  ;;  %v2601_v7 = vor.u32 %v2600_v10, %v2599_v20 }
 0x359   :  { %2149 = vst.msk [vmem:[%s4169_s7 + $0x20] sm:$0xff] %vm720_vm2, %v2133_v19  ;;  %v2136_v27 = vmul.f32 %v2618_v0, %v4008_v63 }
 0x35a   :  { %v2602_v15 = vsel %vm2596_vm14, %v2601_v7, %v2098_v3 }
 0x35b   :  { %2152 = vst.msk [vmem:[%s4169_s7 + $0x38] sm:$0xff] %vm720_vm2, %v2136_v27  ;;  %v2134_v18 = vmul.f32 %v2602_v15, %v4008_v63 }
 0x35d   :  { %2150 = vst.msk [vmem:[%s4169_s7 + $0x28] sm:$0xff] %vm720_vm2, %v2134_v18 }
 0x38b   :  { %v2416_v62 = vpop.f32.mrf.mxu1 }
 0x38c   :  { %v1896_v59 = vmul.f32 %v2416_v62, %v3974_v33 }
 0x38d   :  { %v1848_v8 = vpop.f32.mrf.mxu1 }
 0x38e   :  { %v1919_v17 = vadd.f32 %v3980_v11, %v1896_v59  ;;  %v1894_v31 = vmul.f32 %v3974_v33, %v1848_v8 }
 0x38f   :  { %v2417_v25 = vpop.f32.mrf.mxu1 }
 0x390   :  { %v2049_v44 = vadd.f32 %v2033_v9, %v1919_v17  ;;  %v1917_v50 = vadd.f32 %v3980_v11, %v1894_v31  ;;  %v1897_v36 = vmul.f32 %v2417_v25, %v3974_v33  ;;  %v1982_v9 = vpop.permute.xlu0 %1981  ;;  %v1984_v25 = vpop.permute.xlu1 %1983 }
 0x391   :  { %v1851_v53 = vpop.f32.mrf.mxu1 }
 0x392   :  { %v2065_v54 = vmax.f32 %v2049_v44, 0.0  ;;  %v2047_v40 = vadd.f32 %v2031_v51, %v1917_v50  ;;  %v1920_v26 = vadd.f32 %v3980_v11, %v1897_v36  ;;  %v1895_v38 = vmul.f32 %v3974_v33, %v1851_v53 }
 0x394   :  { %v2082_v43 = vmin.f32 %v3824_v35, %v2065_v54  ;;  %v2063_v45 = vmax.f32 %v2047_v40, 0.0  ;;  %v2050_v60 = vadd.f32 %v2034_v47, %v1920_v26  ;;  %v1918_v29 = vadd.f32 %v3980_v11, %v1895_v38  ;;  %v1986_v42 = vpop.permute.xlu0 %1985  ;;  %v1988_v36 = vpop.permute.xlu1 %1987 }
 0x395   :  { %v2020_v44 = vsel %vm2005_vm7, 0.0, %v1986_v42  ;;  %v2018_v47 = vsel %vm2005_vm7, 0.0, %v1982_v9 }
 0x396   :  { %v2103_v21 = vmul.f32 %v3996_v16, %v2082_v43  ;;  %v2080_v56 = vmin.f32 %v3824_v35, %v2063_v45  ;;  %v2066_v1 = vmax.f32 %v2050_v60, 0.0  ;;  %v2048_v55 = vadd.f32 %v2032_v39, %v1918_v29 }
 0x397   :  { %v2037_v54 = vsel %vm2022_vm4, %v2020_v44, 0.0  ;;  %v2021_v39 = vsel %vm2005_vm7, 0.0, %v1988_v36  ;;  %v2035_v43 = vsel %vm2022_vm4, %v2018_v47, 0.0 }
 0x398   :  { %v2637_v2 = vcvt.f32.s32 %v2103_v21  ;;  %v2101_v3 = vmul.f32 %v3996_v16, %v2080_v56  ;;  %v2083_v48 = vmin.f32 %v3824_v35, %v2066_v1  ;;  %v2064_v52 = vmax.f32 %v2048_v55, 0.0 }
 0x399   :  { %v2635_v49 = vand.u32 2147483647, %v2103_v21  ;;  %v2640_v12 = vand.u32 2147483648, %v2103_v21  ;;  %v2019_v56 = vsel %vm2005_vm7, 0.0, %v1984_v25  ;;  %v2038_v1 = vsel %vm2022_vm4, %v2021_v39, 0.0 }
 0x39a   :  { %v2638_v4 = vcvt.s32.f32 %v2637_v2  ;;  %v2621_v22 = vcvt.f32.s32 %v2101_v3  ;;  %v2104_v14 = vmul.f32 %v3996_v16, %v2083_v48  ;;  %v2081_v6 = vmin.f32 %v3824_v35, %v2064_v52 }
 0x39b   :  { %v2619_v46 = vand.u32 2147483647, %v2101_v3  ;;  %v2624_v57 = vand.u32 2147483648, %v2101_v3  ;;  %vm2636_vm15 = vcmp.lt.f32.partialorder %v2635_v49, 8388608.0 }
 0x39c   :  { %v2639_v37 = vand.u32 2147483647, %v2638_v4  ;;  %v2622_v58 = vcvt.s32.f32 %v2621_v22  ;;  %v2645_v23 = vcvt.f32.s32 %v2104_v14  ;;  %v2102_v24 = vmul.f32 %v3996_v16, %v2081_v6 }
 0x39d   :  { %vm2620_vm0 = vcmp.lt.f32.partialorder %v2619_v46, 8388608.0  ;;  %v2643_v27 = vand.u32 2147483647, %v2104_v14  ;;  %v2648_v61 = vand.u32 2147483648, %v2104_v14  ;;  %v2036_v6 = vsel %vm2022_vm4, %v2019_v56, 0.0 }
 0x39e   :  { %v2641_v13 = vor.u32 %v2640_v12, %v2639_v37  ;;  %v2623_v19 = vand.u32 2147483647, %v2622_v58  ;;  %v2646_v20 = vcvt.s32.f32 %v2645_v23  ;;  %v2629_v10 = vcvt.f32.s32 %v2102_v24 }
 0x39f   :  { %v2627_v32 = vand.u32 2147483647, %v2102_v24  ;;  %v2632_v59 = vand.u32 2147483648, %v2102_v24  ;;  %vm2644_vm1 = vcmp.lt.f32.partialorder %v2643_v27, 8388608.0 }
 0x3a0   :  { %v2642_v0 = vsel %vm2636_vm15, %v2641_v13, %v2103_v21  ;;  %v2625_v7 = vor.u32 %v2624_v57, %v2623_v19  ;;  %v2647_v18 = vand.u32 2147483647, %v2646_v20  ;;  %v2630_v28 = vcvt.s32.f32 %v2629_v10 }
 0x3a1   :  { %v2139_v15 = vmul.f32 %v2642_v0, %v4008_v63  ;;  %vm2628_vm3 = vcmp.lt.f32.partialorder %v2627_v32, 8388608.0 }
 0x3a2   :  { %v2626_v5 = vsel %vm2620_vm0, %v2625_v7, %v2101_v3  ;;  %v2649_v34 = vor.u32 %v2648_v61, %v2647_v18  ;;  %v2631_v30 = vand.u32 2147483647, %v2630_v28 }
 0x3a3   :  { %2155 = vst.msk [vmem:[%s4169_s7 + $0x50] sm:$0xff] %vm720_vm2, %v2139_v15  ;;  %v2137_v62 = vmul.f32 %v2626_v5, %v4008_v63 }
 0x3a4   :  { %v2650_v8 = vsel %vm2644_vm1, %v2649_v34, %v2104_v14  ;;  %v2633_v17 = vor.u32 %v2632_v59, %v2631_v30 }
 0x3a5   :  { %2153 = vst.msk [vmem:[%s4169_s7 + $0x40] sm:$0xff] %vm720_vm2, %v2137_v62  ;;  %v2140_v31 = vmul.f32 %v2650_v8, %v4008_v63 }
 0x3a6   :  { %v2634_v41 = vsel %vm2628_vm3, %v2633_v17, %v2102_v24 }
 0x3a7   :  { %2156 = vst.msk [vmem:[%s4169_s7 + $0x58] sm:$0xff] %vm720_vm2, %v2140_v31  ;;  %v2138_v51 = vmul.f32 %v2634_v41, %v4008_v63 }
 0x3a9   :  { %2154 = vst.msk [vmem:[%s4169_s7 + $0x48] sm:$0xff] %vm720_vm2, %v2138_v51 }
 0x3ae   :  { %v2420_v50 = vpop.f32.mrf.mxu1 }
 0x3af   :  { %v1900_v53 = vmul.f32 %v2420_v50, %v3974_v33 }
 0x3b0   :  { %v1864_v40 = vpop.f32.mrf.mxu1 }
 0x3b1   :  { %v1923_v26 = vadd.f32 %v3980_v11, %v1900_v53  ;;  %v1898_v38 = vmul.f32 %v3974_v33, %v1864_v40 }
 0x3b2   :  { %v2421_v45 = vpop.f32.mrf.mxu1 }
 0x3b3   :  { %v2053_v60 = vadd.f32 %v2037_v54, %v1923_v26  ;;  %v1921_v29 = vadd.f32 %v3980_v11, %v1898_v38  ;;  %v1901_v21 = vmul.f32 %v2421_v45, %v3974_v33 }
 0x3b4   :  { %v1867_v55 = vpop.f32.mrf.mxu1 }
 0x3b5   :  { %v2069_v2 = vmax.f32 %v2053_v60, 0.0  ;;  %v2051_v3 = vadd.f32 %v2035_v43, %v1921_v29  ;;  %v1924_v48 = vadd.f32 %v3980_v11, %v1901_v21  ;;  %v1899_v52 = vmul.f32 %v3974_v33, %v1867_v55 }
 0x3b7   :  { %v2086_v4 = vmin.f32 %v3824_v35, %v2069_v2  ;;  %v2067_v22 = vmax.f32 %v2051_v3, 0.0  ;;  %v2054_v49 = vadd.f32 %v2038_v1, %v1924_v48  ;;  %v1922_v14 = vadd.f32 %v3980_v11, %v1899_v52 }
 0x3b9   :  { %v2107_v37 = vmul.f32 %v3996_v16, %v2086_v4  ;;  %v2084_v12 = vmin.f32 %v3824_v35, %v2067_v22  ;;  %v2070_v46 = vmax.f32 %v2054_v49, 0.0  ;;  %v2052_v58 = vadd.f32 %v2036_v6, %v1922_v14 }
 0x3bb   :  { %v2669_v23 = vcvt.f32.s32 %v2107_v37  ;;  %v2105_v24 = vmul.f32 %v3996_v16, %v2084_v12  ;;  %v2087_v13 = vmin.f32 %v3824_v35, %v2070_v46  ;;  %v2068_v33 = vmax.f32 %v2052_v58, 0.0 }
 0x3bc   :  { %v2667_v20 = vand.u32 2147483647, %v2107_v37  ;;  %v2672_v7 = vand.u32 2147483648, %v2107_v37 }
 0x3bd   :  { %v2670_v19 = vcvt.s32.f32 %v2669_v23  ;;  %v2653_v57 = vcvt.f32.s32 %v2105_v24  ;;  %v2108_v10 = vmul.f32 %v3996_v16, %v2087_v13  ;;  %v2085_v11 = vmin.f32 %v3824_v35, %v2068_v33 }
 0x3be   :  { %v2651_v27 = vand.u32 2147483647, %v2105_v24  ;;  %v2656_v32 = vand.u32 2147483648, %v2105_v24  ;;  %vm2668_vm5 = vcmp.lt.f32.partialorder %v2667_v20, 8388608.0 }
 0x3bf   :  { %v2671_v0 = vand.u32 2147483647, %v2670_v19  ;;  %v2654_v15 = vcvt.s32.f32 %v2653_v57  ;;  %v2677_v18 = vcvt.f32.s32 %v2108_v10  ;;  %v2106_v61 = vmul.f32 %v3996_v16, %v2085_v11 }
 0x3c0   :  { %vm2652_vm7 = vcmp.lt.f32.partialorder %v2651_v27, 8388608.0  ;;  %v2675_v9 = vand.u32 2147483647, %v2108_v10  ;;  %v2680_v17 = vand.u32 2147483648, %v2108_v10 }
 0x3c1   :  { %v2673_v28 = vor.u32 %v2672_v7, %v2671_v0  ;;  %v2655_v5 = vand.u32 2147483647, %v2654_v15  ;;  %v2678_v62 = vcvt.s32.f32 %v2677_v18  ;;  %v2661_v34 = vcvt.f32.s32 %v2106_v61 }
 0x3c2   :  { %v2659_v51 = vand.u32 2147483647, %v2106_v61  ;;  %v2664_v44 = vand.u32 2147483648, %v2106_v61  ;;  %vm2676_vm4 = vcmp.lt.f32.partialorder %v2675_v9, 8388608.0 }
 0x3c3   :  { %v2674_v30 = vsel %vm2668_vm5, %v2673_v28, %v2107_v37  ;;  %v2657_v59 = vor.u32 %v2656_v32, %v2655_v5  ;;  %v2679_v35 = vand.u32 2147483647, %v2678_v62  ;;  %v2662_v31 = vcvt.s32.f32 %v2661_v34 }
 0x3c4   :  { %v2143_v8 = vmul.f32 %v2674_v30, %v4008_v63  ;;  %vm2660_vm6 = vcmp.lt.f32.partialorder %v2659_v51, 8388608.0 }
 0x3c5   :  { %v2658_v41 = vsel %vm2652_vm7, %v2657_v59, %v2105_v24  ;;  %v2681_v25 = vor.u32 %v2680_v17, %v2679_v35  ;;  %v2663_v42 = vand.u32 2147483647, %v2662_v31 }
 0x3c6   :  { %2159 = vst.msk [vmem:[%s4169_s7 + $0x70] sm:$0xff] %vm720_vm2, %v2143_v8  ;;  %v2141_v16 = vmul.f32 %v2658_v41, %v4008_v63 }
 0x3c7   :  { %v2682_v50 = vsel %vm2676_vm4, %v2681_v25, %v2108_v10  ;;  %v2665_v36 = vor.u32 %v2664_v44, %v2663_v42 }
 0x3c8   :  { %2157 = vst.msk [vmem:[%s4169_s7 + $0x60] sm:$0xff] %vm720_vm2, %v2141_v16  ;;  %v2144_v47 = vmul.f32 %v2682_v50, %v4008_v63 }
 0x3c9   :  { %v2666_v53 = vsel %vm2660_vm6, %v2665_v36, %v2106_v61 }
 0x3ca   :  { %2160 = vst.msk [vmem:[%s4169_s7 + $0x78] sm:$0xff] %vm720_vm2, %v2144_v47  ;;  %v2142_v54 = vmul.f32 %v2666_v53, %v4008_v63 }
 0x3cc   :  { %2158 = vst.msk [vmem:[%s4169_s7 + $0x68] sm:$0xff] %vm720_vm2, %v2142_v54 }
 0x3cd   :  { %2165 = vsyncpa [#allocation4], 1 }

</bundles_post_ra>
